<compile_context>
chip_gen: v7x
topology: tpu7x:2x2x1
jax: 0.10.0
libtpu: 0.0.40
codegen_flags: <defaults>
</compile_context>

<pallas_src>
from functools import partial

import jax
import jax.numpy as jnp
from jax import lax
from jax.experimental import pallas as pl
from jax.experimental.pallas import tpu as pltpu


def _round_up(v, m):
    return (v + m - 1) // m * m


def _vmem_cap_bytes():
    """Physical VMEM capacity minus headroom (safe fallback if query fails)."""
    try:
        info = pltpu.get_tpu_info()
        cap = int(getattr(info, "vmem_capacity_bytes", 0)) or (64 << 20)
    except Exception:
        cap = 64 << 20
    return max(cap - (8 << 20), 16 << 20)


def _ffn_kernel(TT, K, P, NX, NH, Cpad, Hpad,
                x_ref, mask_ref, w0_ref, b0_ref, w1_ref, b1_ref,
                out_ref, xw, hw):
    """One (batch, time-tile) grid step.

    x_ref   : [1, TROWS, Cpad] bf16  whole halo-padded sequence (resident per batch)
    mask_ref: [1, TROWS, 1]    f32
    w0_ref  : [K*Cpad, Hpad]   bf16  fused-tap conv_0 weight (resident)
    b0_ref  : [1, Hpad]        f32
    w1_ref  : [K*Hpad, Cpad]   bf16  fused-tap conv_1 weight (resident)
    b1_ref  : [1, Cpad]        f32
    out_ref : [1, TT, Cpad]    f32   output tile
    xw      : [NXr, Cpad]      bf16  scratch: masked conv_0 input window (+halo)
    hw      : [NHr, Hpad]      bf16  scratch: masked conv_1 input window (+halo)

    The HBM arrays are left-padded by HL = 2P zero rows, so the conv_0 input
    window of tile t starts at row s = t*TT (sublane aligned) and every slice
    below stays in bounds; right halo rows are likewise zero in HBM.
    """
    t = pl.program_id(1)
    s = pl.multiple_of(t * TT, 8)            # window base (= HL + t*TT - 2P)

    # conv_0 input window: (x * mask) in bf16 (exact -- mask is 0/1).
    mx = mask_ref[0, pl.ds(s, NX), :].astype(xw.dtype)             # [NX, 1]
    xw[:NX, :] = x_ref[0, pl.ds(s, NX), :] * mx

    # conv_0: K accumulating MXU dots over shifted slices of the window.
    z = jnp.dot(xw[0:NH, :], w0_ref[0:Cpad, :],
                preferred_element_type=jnp.float32)
    for k in range(1, K):
        z = z + jnp.dot(xw[k:k + NH, :], w0_ref[k * Cpad:(k + 1) * Cpad, :],
                        preferred_element_type=jnp.float32)
    z = z + b0_ref[...]

    # GELU(approximate='tanh'); Dropout is identity at inference.
    h = jax.nn.gelu(z, approximate=True)

    # conv_1 input window: (h * mask) in bf16.
    mh = mask_ref[0, pl.ds(s + P, NH), :].astype(hw.dtype)         # [NH, 1]
    hw[:NH, :] = h.astype(hw.dtype) * mh

    # conv_1: K accumulating MXU dots.
    y = jnp.dot(hw[0:TT, :], w1_ref[0:Hpad, :],
                preferred_element_type=jnp.float32)
    for k in range(1, K):
        y = y + jnp.dot(hw[k:k + TT, :], w1_ref[k * Hpad:(k + 1) * Hpad, :],
                        preferred_element_type=jnp.float32)
    y = y + b1_ref[...]

    # Final mask multiply on the TT output rows (f32 output).
    mo = mask_ref[0, pl.ds(s + 2 * P, TT), :]                      # [TT, 1] f32
    out_ref[0] = (y * mo).astype(out_ref.dtype)


def ffn_forward(x_nct, float_masks, params, *, kernel_size, tile_t=256):
    """x_nct: [B, C, T] f32, float_masks: [B, 1, T] f32  ->  [B, C, T] f32."""
    B, C, T = x_nct.shape
    K = kernel_size
    P = (K - 1) // 2
    R = K - 1 - P                          # right reach (== P for odd K)
    H = params["w0"].shape[0]              # calc_channels

    LANE, SUB = 128, 8
    Cpad = _round_up(max(C, LANE), LANE)
    Hpad = _round_up(max(H, LANE), LANE)

    # Time tiling: TT output rows per grid step.
    TT = min(_round_up(tile_t, SUB), _round_up(T, SUB))
    Tpad = _round_up(T, TT)
    NT = Tpad // TT
    NX = TT + 2 * (K - 1)                  # conv_0 input window rows (with halo)
    NH = TT + (K - 1)                      # conv_1 input window rows (with halo)

    # HBM-level zero halo on the time axis: left = 2P (so the window base is the
    # sublane-aligned t*TT), right >= 2R, padded so total rows are a multiple of 8.
    HL = 2 * P
    HR = 2 * R + (-(HL + Tpad + 2 * R)) % SUB
    TROWS = HL + Tpad + HR

    # NCT -> NTC (channels on lanes), bf16, channel pad to lane multiple, time halo.
    x = jnp.transpose(x_nct, (0, 2, 1)).astype(jnp.bfloat16)            # [B, T, C]
    x = jnp.pad(x, ((0, 0), (HL, Tpad - T + HR), (0, Cpad - C)))
    mask = jnp.transpose(float_masks, (0, 2, 1)).astype(jnp.float32)    # [B, T, 1]
    mask = jnp.pad(mask, ((0, 0), (HL, Tpad - T + HR), (0, 0)))

    # Fused-tap weight layout: w_fused[k*Cin_pad + cin, cout] = w_torch[cout, cin, k]
    def fuse_w(w, cin_pad, cout_pad):
        cout, cin, k = w.shape
        wt = jnp.transpose(w, (2, 1, 0))                                 # [K, Cin, Cout]
        wt = jnp.pad(wt, ((0, 0), (0, cin_pad - cin), (0, cout_pad - cout)))
        return wt.reshape(k * cin_pad, cout_pad).astype(jnp.bfloat16)

    w0 = fuse_w(params["w0"], Cpad, Hpad)                                # [K*Cpad, Hpad]
    b0 = jnp.pad(params["b0"], (0, Hpad - H)).reshape(1, Hpad).astype(jnp.float32)
    w1 = fuse_w(params["w1"], Hpad, Cpad)                                # [K*Hpad, Cpad]
    b1 = jnp.pad(params["b1"], (0, Cpad - C)).reshape(1, Cpad).astype(jnp.float32)

    NXr = _round_up(NX, SUB)
    NHr = _round_up(NH, SUB)

    kernel = partial(_ffn_kernel, TT, K, P, NX, NH, Cpad, Hpad)

    def run(single_buffer_weights):
        wkw = {}
        if single_buffer_weights and hasattr(pl, "Buffered"):
            # Constant-index (resident) blocks never change; double-buffering them
            # only wastes VMEM.
            wkw = dict(pipeline_mode=pl.Buffered(1))
        n_wbuf = 1 if wkw else 2

        # VMEM budget: double-buffered activation blocks + weights + scratch +
        # in-kernel f32 intermediates, capped by physical VMEM minus headroom.
        block_bytes = TROWS * Cpad * 2 + TROWS * 4 + TT * Cpad * 4   # x + mask + out
        weight_bytes = (w0.size + w1.size) * 2 + (b0.size + b1.size) * 4
        scratch_bytes = NXr * Cpad * 2 + NHr * Hpad * 2
        temp_bytes = 2 * NH * Hpad * 4 + TT * Cpad * 4               # z/h + y (f32)
        vmem_bytes = (2 * block_bytes + n_wbuf * weight_bytes + scratch_bytes
                      + temp_bytes + (4 << 20))
        vmem_bytes = int(min(max(vmem_bytes, 32 << 20), _vmem_cap_bytes()))

        return pl.pallas_call(
            kernel,
            out_shape=jax.ShapeDtypeStruct((B, Tpad, Cpad), jnp.float32),
            grid=(B, NT),
            in_specs=[
                pl.BlockSpec((1, TROWS, Cpad), lambda b, t: (b, 0, 0)),   # x (per batch)
                pl.BlockSpec((1, TROWS, 1), lambda b, t: (b, 0, 0)),      # mask
                pl.BlockSpec((K * Cpad, Hpad), lambda b, t: (0, 0), **wkw),
                pl.BlockSpec((1, Hpad), lambda b, t: (0, 0), **wkw),
                pl.BlockSpec((K * Hpad, Cpad), lambda b, t: (0, 0), **wkw),
                pl.BlockSpec((1, Cpad), lambda b, t: (0, 0), **wkw),
            ],
            out_specs=pl.BlockSpec((1, TT, Cpad), lambda b, t: (b, t, 0)),
            scratch_shapes=[pltpu.VMEM((NXr, Cpad), jnp.bfloat16),
                            pltpu.VMEM((NHr, Hpad), jnp.bfloat16)],
            compiler_params=pltpu.CompilerParams(
                dimension_semantics=("parallel", "parallel"),
                vmem_limit_bytes=vmem_bytes),
        )(x, mask, w0, b0, w1, b1)

    try:
        out_ntc = run(single_buffer_weights=True)
    except Exception:
        # pipeline_mode=pl.Buffered(1) not supported on this jax/Mosaic version.
        out_ntc = run(single_buffer_weights=False)

    # Back to NCT, drop time/channel padding.
    return jnp.transpose(out_ntc[:, :T, :C], (0, 2, 1))


def init_params(key, channels, calc_channels, K):
    k0, k1, k2, k3 = jax.random.split(key, 4)
    return dict(
        w0=0.1 * jax.random.normal(k0, (calc_channels, channels, K), jnp.float32),
        b0=0.1 * jax.random.normal(k1, (calc_channels,), jnp.float32),
        w1=0.1 * jax.random.normal(k2, (channels, calc_channels, K), jnp.float32),
        b1=0.1 * jax.random.normal(k3, (channels,), jnp.float32),
    )


def ref_ffn(x, masks, params, *, kernel_size, quantize_bf16=False):
    """Pure-JAX reference in PyTorch NCT layout (f32, or bf16-quantized inputs)."""
    K = kernel_size
    P = (K - 1) // 2
    dn = ("NCH", "OIH", "NCH")
    bf = (lambda a: a.astype(jnp.bfloat16).astype(jnp.float32)) if quantize_bf16 \
        else (lambda a: a)
    h = lax.conv_general_dilated(
        bf(x * masks), bf(params["w0"]), (1,), [(P, P)],
        dimension_numbers=dn, precision=lax.Precision.HIGHEST
    ) + params["b0"][None, :, None]
    h = jax.nn.gelu(h, approximate=True)
    y = lax.conv_general_dilated(
        bf(h * masks), bf(params["w1"]), (1,), [(P, P)],
        dimension_numbers=dn, precision=lax.Precision.HIGHEST
    ) + params["b1"][None, :, None]
    return y * masks


if __name__ == "__main__":
    B, C, H, T, K = 2, 4, 8, 16, 3   # batch, channels, calc_channels, time, kernel

    key = jax.random.PRNGKey(0)
    k1, k2 = jax.random.split(key, 2)
    x = jax.random.normal(k1, (B, C, T), jnp.float32)
    lens = jnp.array([T, 11])
    masks = (jnp.arange(T)[None, None, :] < lens[:, None, None]).astype(jnp.float32)

    params = init_params(k2, C, H, K)

    out = ffn_forward(x, masks, params, kernel_size=K)
    out = jax.block_until_ready(out)
    assert out.shape == (B, C, T)

    # Tight check against a reference that quantizes matmul inputs to bf16 the same
    # way the kernel does (validates the fused-conv / mask / halo / GELU structure).
    ref_q = ref_ffn(x, masks, params, kernel_size=K, quantize_bf16=True)
    err_q = float(jnp.max(jnp.abs(out - ref_q)))
    assert jnp.allclose(out, ref_q, atol=1e-3, rtol=1e-3), f"bf16-ref max err {err_q}"

    # Loose check against the full-f32 module semantics (bf16-operand tolerance).
    ref = ref_ffn(x, masks, params, kernel_size=K, quantize_bf16=False)
    err = float(jnp.max(jnp.abs(out - ref)))
    assert jnp.allclose(out, ref, atol=5e-2, rtol=5e-2), f"f32-ref max err {err}"

    print("KERNEL_OK")
</pallas_src>

<mosaic_0001>
module attributes {stable_mosaic.version = 11 : i64} {
  func.func @_ffn_kernel(%arg0: i32, %arg1: i32, %arg2: memref<1x24x128xbf16, #tpu.memory_space<vmem>>, %arg3: memref<1x24x1xf32, #tpu.memory_space<vmem>>, %arg4: memref<384x128xbf16, #tpu.memory_space<vmem>>, %arg5: memref<1x128xf32, #tpu.memory_space<vmem>>, %arg6: memref<384x128xbf16, #tpu.memory_space<vmem>>, %arg7: memref<1x128xf32, #tpu.memory_space<vmem>>, %arg8: memref<1x16x128xf32, #tpu.memory_space<vmem>>, %arg9: memref<24x128xbf16, #tpu.memory_space<vmem>>, %arg10: memref<24x128xbf16, #tpu.memory_space<vmem>>) attributes {dimension_semantics = [#tpu.dimension_semantics<parallel>, #tpu.dimension_semantics<parallel>], iteration_bounds = array<i64: 2, 1>, scalar_prefetch = 0 : i64, scratch_operands = 2 : i64, tpu.core_type = #tpu.core_type<tc>, window_params = [{transform_indices = @transform_0, window_bounds = array<i64: 1, 24, 128>}, {transform_indices = @transform_1, window_bounds = array<i64: 1, 24, 1>}, {pipeline_mode = #tpu.pipeline_mode<synchronous>, transform_indices = @transform_2, window_bounds = array<i64: 384, 128>}, {pipeline_mode = #tpu.pipeline_mode<synchronous>, transform_indices = @transform_3, window_bounds = array<i64: 1, 128>}, {pipeline_mode = #tpu.pipeline_mode<synchronous>, transform_indices = @transform_4, window_bounds = array<i64: 384, 128>}, {pipeline_mode = #tpu.pipeline_mode<synchronous>, transform_indices = @transform_5, window_bounds = array<i64: 1, 128>}, {transform_indices = @transform_6, window_bounds = array<i64: 1, 16, 128>}]} {
    %c16_i32 = arith.constant 16 : i32
    %0 = arith.muli %arg1, %c16_i32 : i32
    %1 = tpu.assume_multiple %0, 8 : i32
    %c0 = arith.constant 0 : index
    %2 = arith.index_cast %1 : i32 to index
    %c0_0 = arith.constant 0 : index
    %3 = vector.load %arg3[%c0, %2, %c0_0] : memref<1x24x1xf32, #tpu.memory_space<vmem>>, vector<1x20x1xf32>
    %4 = vector.shape_cast %3 : vector<1x20x1xf32> to vector<20x1xf32>
    %5 = arith.truncf %4 : vector<20x1xf32> to vector<20x1xbf16>
    %c0_1 = arith.constant 0 : index
    %6 = arith.index_cast %1 : i32 to index
    %c0_2 = arith.constant 0 : index
    %7 = vector.load %arg2[%c0_1, %6, %c0_2] : memref<1x24x128xbf16, #tpu.memory_space<vmem>>, vector<1x20x128xbf16>
    %8 = vector.shape_cast %7 : vector<1x20x128xbf16> to vector<20x128xbf16>
    %9 = vector.broadcast %5 : vector<20x1xbf16> to vector<20x128xbf16>
    %10 = arith.mulf %8, %9 : vector<20x128xbf16>
    %c0_3 = arith.constant 0 : index
    %c0_4 = arith.constant 0 : index
    %11 = vector.load %arg9[%c0_3, %c0_4] : memref<24x128xbf16, #tpu.memory_space<vmem>>, vector<20x128xbf16>
    tpu.vector_store %arg9[%c0_3, %c0_4], %10 {strides = array<i32>} : memref<24x128xbf16, #tpu.memory_space<vmem>>, vector<20x128xbf16>,
    %c0_5 = arith.constant 0 : index
    %c0_6 = arith.constant 0 : index
    %12 = vector.load %arg9[%c0_5, %c0_6] : memref<24x128xbf16, #tpu.memory_space<vmem>>, vector<18x128xbf16>
    %c0_7 = arith.constant 0 : index
    %c0_8 = arith.constant 0 : index
    %13 = vector.load %arg4[%c0_7, %c0_8] : memref<384x128xbf16, #tpu.memory_space<vmem>>, vector<128x128xbf16>
    %cst = arith.constant dense<0.000000e+00> : vector<18x128xf32>
    %14 = tpu.matmul %12, %13, %cst {dimension_numbers = #tpu.dot_dimension_numbers<[1], [0], [0], [1], [0, 0, 1, 1], [], []>} : vector<18x128xbf16>, vector<128x128xbf16>, vector<18x128xf32> -> vector<18x128xf32>
    %c1 = arith.constant 1 : index
    %c0_9 = arith.constant 0 : index
    %15 = vector.load %arg9[%c1, %c0_9] : memref<24x128xbf16, #tpu.memory_space<vmem>>, vector<18x128xbf16>
    %c128 = arith.constant 128 : index
    %c0_10 = arith.constant 0 : index
    %16 = vector.load %arg4[%c128, %c0_10] : memref<384x128xbf16, #tpu.memory_space<vmem>>, vector<128x128xbf16>
    %cst_11 = arith.constant dense<0.000000e+00> : vector<18x128xf32>
    %17 = tpu.matmul %15, %16, %cst_11 {dimension_numbers = #tpu.dot_dimension_numbers<[1], [0], [0], [1], [0, 0, 1, 1], [], []>} : vector<18x128xbf16>, vector<128x128xbf16>, vector<18x128xf32> -> vector<18x128xf32>
    %18 = arith.addf %14, %17 : vector<18x128xf32>
    %c2 = arith.constant 2 : index
    %c0_12 = arith.constant 0 : index
    %19 = vector.load %arg9[%c2, %c0_12] : memref<24x128xbf16, #tpu.memory_space<vmem>>, vector<18x128xbf16>
    %c256 = arith.constant 256 : index
    %c0_13 = arith.constant 0 : index
    %20 = vector.load %arg4[%c256, %c0_13] : memref<384x128xbf16, #tpu.memory_space<vmem>>, vector<128x128xbf16>
    %cst_14 = arith.constant dense<0.000000e+00> : vector<18x128xf32>
    %21 = tpu.matmul %19, %20, %cst_14 {dimension_numbers = #tpu.dot_dimension_numbers<[1], [0], [0], [1], [0, 0, 1, 1], [], []>} : vector<18x128xbf16>, vector<128x128xbf16>, vector<18x128xf32> -> vector<18x128xf32>
    %22 = arith.addf %18, %21 : vector<18x128xf32>
    %c0_15 = arith.constant 0 : index
    %c0_16 = arith.constant 0 : index
    %23 = vector.load %arg5[%c0_15, %c0_16] : memref<1x128xf32, #tpu.memory_space<vmem>>, vector<1x128xf32>
    %24 = vector.broadcast %23 : vector<1x128xf32> to vector<18x128xf32>
    %25 = arith.addf %22, %24 : vector<18x128xf32>
    %26 = arith.mulf %25, %25 : vector<18x128xf32>
    %27 = arith.mulf %25, %26 : vector<18x128xf32>
    %cst_17 = arith.constant 4.471500e-02 : f32
    %28 = vector.broadcast %cst_17 : f32 to vector<18x128xf32>
    %29 = arith.mulf %28, %27 : vector<18x128xf32>
    %30 = arith.addf %25, %29 : vector<18x128xf32>
    %cst_18 = arith.constant 0.797884583 : f32
    %31 = vector.broadcast %cst_18 : f32 to vector<18x128xf32>
    %32 = arith.mulf %31, %30 : vector<18x128xf32>
    %33 = math.tanh %32 : vector<18x128xf32>
    %cst_19 = arith.constant 1.000000e+00 : f32
    %34 = vector.broadcast %cst_19 : f32 to vector<18x128xf32>
    %35 = arith.addf %34, %33 : vector<18x128xf32>
    %cst_20 = arith.constant 5.000000e-01 : f32
    %36 = vector.broadcast %cst_20 : f32 to vector<18x128xf32>
    %37 = arith.mulf %36, %35 : vector<18x128xf32>
    %38 = arith.mulf %25, %37 : vector<18x128xf32>
    %c1_i32 = arith.constant 1 : i32
    %39 = arith.addi %1, %c1_i32 : i32
    %c0_21 = arith.constant 0 : index
    %40 = arith.index_cast %39 : i32 to index
    %c0_22 = arith.constant 0 : index
    %41 = vector.load %arg3[%c0_21, %40, %c0_22] : memref<1x24x1xf32, #tpu.memory_space<vmem>>, vector<1x18x1xf32>
    %42 = vector.shape_cast %41 : vector<1x18x1xf32> to vector<18x1xf32>
    %43 = arith.truncf %42 : vector<18x1xf32> to vector<18x1xbf16>
    %44 = arith.truncf %38 : vector<18x128xf32> to vector<18x128xbf16>
    %45 = vector.broadcast %43 : vector<18x1xbf16> to vector<18x128xbf16>
    %46 = arith.mulf %44, %45 : vector<18x128xbf16>
    %c0_23 = arith.constant 0 : index
    %c0_24 = arith.constant 0 : index
    %47 = vector.load %arg10[%c0_23, %c0_24] : memref<24x128xbf16, #tpu.memory_space<vmem>>, vector<18x128xbf16>
    tpu.vector_store %arg10[%c0_23, %c0_24], %46 {strides = array<i32>} : memref<24x128xbf16, #tpu.memory_space<vmem>>, vector<18x128xbf16>,
    %c0_25 = arith.constant 0 : index
    %c0_26 = arith.constant 0 : index
    %48 = vector.load %arg10[%c0_25, %c0_26] : memref<24x128xbf16, #tpu.memory_space<vmem>>, vector<16x128xbf16>
    %c0_27 = arith.constant 0 : index
    %c0_28 = arith.constant 0 : index
    %49 = vector.load %arg6[%c0_27, %c0_28] : memref<384x128xbf16, #tpu.memory_space<vmem>>, vector<128x128xbf16>
    %cst_29 = arith.constant dense<0.000000e+00> : vector<16x128xf32>
    %50 = tpu.matmul %48, %49, %cst_29 {dimension_numbers = #tpu.dot_dimension_numbers<[1], [0], [0], [1], [0, 0, 1, 1], [], []>} : vector<16x128xbf16>, vector<128x128xbf16>, vector<16x128xf32> -> vector<16x128xf32>
    %c1_30 = arith.constant 1 : index
    %c0_31 = arith.constant 0 : index
    %51 = vector.load %arg10[%c1_30, %c0_31] : memref<24x128xbf16, #tpu.memory_space<vmem>>, vector<16x128xbf16>
    %c128_32 = arith.constant 128 : index
    %c0_33 = arith.constant 0 : index
    %52 = vector.load %arg6[%c128_32, %c0_33] : memref<384x128xbf16, #tpu.memory_space<vmem>>, vector<128x128xbf16>
    %cst_34 = arith.constant dense<0.000000e+00> : vector<16x128xf32>
    %53 = tpu.matmul %51, %52, %cst_34 {dimension_numbers = #tpu.dot_dimension_numbers<[1], [0], [0], [1], [0, 0, 1, 1], [], []>} : vector<16x128xbf16>, vector<128x128xbf16>, vector<16x128xf32> -> vector<16x128xf32>
    %54 = arith.addf %50, %53 : vector<16x128xf32>
    %c2_35 = arith.constant 2 : index
    %c0_36 = arith.constant 0 : index
    %55 = vector.load %arg10[%c2_35, %c0_36] : memref<24x128xbf16, #tpu.memory_space<vmem>>, vector<16x128xbf16>
    %c256_37 = arith.constant 256 : index
    %c0_38 = arith.constant 0 : index
    %56 = vector.load %arg6[%c256_37, %c0_38] : memref<384x128xbf16, #tpu.memory_space<vmem>>, vector<128x128xbf16>
    %cst_39 = arith.constant dense<0.000000e+00> : vector<16x128xf32>
    %57 = tpu.matmul %55, %56, %cst_39 {dimension_numbers = #tpu.dot_dimension_numbers<[1], [0], [0], [1], [0, 0, 1, 1], [], []>} : vector<16x128xbf16>, vector<128x128xbf16>, vector<16x128xf32> -> vector<16x128xf32>
    %58 = arith.addf %54, %57 : vector<16x128xf32>
    %c0_40 = arith.constant 0 : index
    %c0_41 = arith.constant 0 : index
    %59 = vector.load %arg7[%c0_40, %c0_41] : memref<1x128xf32, #tpu.memory_space<vmem>>, vector<1x128xf32>
    %60 = vector.broadcast %59 : vector<1x128xf32> to vector<16x128xf32>
    %61 = arith.addf %58, %60 : vector<16x128xf32>
    %c2_i32 = arith.constant 2 : i32
    %62 = arith.addi %1, %c2_i32 : i32
    %c0_42 = arith.constant 0 : index
    %63 = arith.index_cast %62 : i32 to index
    %c0_43 = arith.constant 0 : index
    %64 = vector.load %arg3[%c0_42, %63, %c0_43] : memref<1x24x1xf32, #tpu.memory_space<vmem>>, vector<1x16x1xf32>
    %65 = vector.shape_cast %64 : vector<1x16x1xf32> to vector<16x1xf32>
    %66 = vector.broadcast %65 : vector<16x1xf32> to vector<16x128xf32>
    %67 = arith.mulf %61, %66 : vector<16x128xf32>
    %c0_44 = arith.constant 0 : index
    %c0_45 = arith.constant 0 : index
    %c0_46 = arith.constant 0 : index
    %68 = vector.load %arg8[%c0_44, %c0_45, %c0_46] : memref<1x16x128xf32, #tpu.memory_space<vmem>>, vector<1x16x128xf32>
    %69 = vector.shape_cast %68 : vector<1x16x128xf32> to vector<16x128xf32>
    %70 = vector.shape_cast %67 : vector<16x128xf32> to vector<1x16x128xf32>
    tpu.vector_store %arg8[%c0_44, %c0_45, %c0_46], %70 {strides = array<i32>} : memref<1x16x128xf32, #tpu.memory_space<vmem>>, vector<1x16x128xf32>,
    return
  }
  func.func @transform_0(%arg0: i32, %arg1: i32) -> (i32, i32, i32) {
    %c0_i32 = arith.constant 0 : i32
    %c0_i32_0 = arith.constant 0 : i32
    %c0_i32_1 = arith.constant 0 : i32
    return %arg0, %c0_i32, %c0_i32_0 : i32, i32, i32
  }
  func.func @transform_1(%arg0: i32, %arg1: i32) -> (i32, i32, i32) {
    %c0_i32 = arith.constant 0 : i32
    %c0_i32_0 = arith.constant 0 : i32
    %c0_i32_1 = arith.constant 0 : i32
    return %arg0, %c0_i32, %c0_i32_0 : i32, i32, i32
  }
  func.func @transform_2(%arg0: i32, %arg1: i32) -> (i32, i32) {
    %c0_i32 = arith.constant 0 : i32
    %c0_i32_0 = arith.constant 0 : i32
    %c0_i32_1 = arith.constant 0 : i32
    return %c0_i32, %c0_i32_0 : i32, i32
  }
  func.func @transform_3(%arg0: i32, %arg1: i32) -> (i32, i32) {
    %c0_i32 = arith.constant 0 : i32
    %c0_i32_0 = arith.constant 0 : i32
    %c0_i32_1 = arith.constant 0 : i32
    return %c0_i32, %c0_i32_0 : i32, i32
  }
  func.func @transform_4(%arg0: i32, %arg1: i32) -> (i32, i32) {
    %c0_i32 = arith.constant 0 : i32
    %c0_i32_0 = arith.constant 0 : i32
    %c0_i32_1 = arith.constant 0 : i32
    return %c0_i32, %c0_i32_0 : i32, i32
  }
  func.func @transform_5(%arg0: i32, %arg1: i32) -> (i32, i32) {
    %c0_i32 = arith.constant 0 : i32
    %c0_i32_0 = arith.constant 0 : i32
    %c0_i32_1 = arith.constant 0 : i32
    return %c0_i32, %c0_i32_0 : i32, i32
  }
  func.func @transform_6(%arg0: i32, %arg1: i32) -> (i32, i32, i32) {
    %c0_i32 = arith.constant 0 : i32
    %c0_i32_0 = arith.constant 0 : i32
    return %arg0, %arg1, %c0_i32 : i32, i32, i32
  }
}

module attributes {stable_mosaic.version = 11 : i64} {
  func.func @_ffn_kernel(%arg0: i32, %arg1: i32, %arg2: memref<1x24x128xbf16, #tpu.memory_space<vmem>>, %arg3: memref<1x24x1xf32, #tpu.memory_space<vmem>>, %arg4: memref<384x128xbf16, #tpu.memory_space<vmem>>, %arg5: memref<1x128xf32, #tpu.memory_space<vmem>>, %arg6: memref<384x128xbf16, #tpu.memory_space<vmem>>, %arg7: memref<1x128xf32, #tpu.memory_space<vmem>>, %arg8: memref<1x16x128xf32, #tpu.memory_space<vmem>>, %arg9: memref<24x128xbf16, #tpu.memory_space<vmem>>, %arg10: memref<24x128xbf16, #tpu.memory_space<vmem>>) attributes {dimension_semantics = [#tpu.dimension_semantics<parallel>, #tpu.dimension_semantics<parallel>], iteration_bounds = array<i64: 2, 1>, scalar_prefetch = 0 : i64, scratch_operands = 2 : i64, tpu.core_type = #tpu.core_type<tc>, window_params = [{transform_indices = @transform_0, window_bounds = array<i64: 1, 24, 128>}, {transform_indices = @transform_1, window_bounds = array<i64: 1, 24, 1>}, {pipeline_mode = #tpu.pipeline_mode<synchronous>, transform_indices = @transform_2, window_bounds = array<i64: 384, 128>}, {pipeline_mode = #tpu.pipeline_mode<synchronous>, transform_indices = @transform_3, window_bounds = array<i64: 1, 128>}, {pipeline_mode = #tpu.pipeline_mode<synchronous>, transform_indices = @transform_4, window_bounds = array<i64: 384, 128>}, {pipeline_mode = #tpu.pipeline_mode<synchronous>, transform_indices = @transform_5, window_bounds = array<i64: 1, 128>}, {transform_indices = @transform_6, window_bounds = array<i64: 1, 16, 128>}]} {
    %c16_i32 = arith.constant 16 : i32
    %0 = arith.muli %arg1, %c16_i32 : i32
    %1 = tpu.assume_multiple %0, 8 : i32
    %c0 = arith.constant 0 : index
    %2 = arith.index_cast %1 : i32 to index
    %c0_0 = arith.constant 0 : index
    %3 = vector.load %arg3[%c0, %2, %c0_0] : memref<1x24x1xf32, #tpu.memory_space<vmem>>, vector<1x20x1xf32>
    %4 = vector.shape_cast %3 : vector<1x20x1xf32> to vector<20x1xf32>
    %5 = arith.truncf %4 : vector<20x1xf32> to vector<20x1xbf16>
    %c0_1 = arith.constant 0 : index
    %6 = arith.index_cast %1 : i32 to index
    %c0_2 = arith.constant 0 : index
    %7 = vector.load %arg2[%c0_1, %6, %c0_2] : memref<1x24x128xbf16, #tpu.memory_space<vmem>>, vector<1x20x128xbf16>
    %8 = vector.shape_cast %7 : vector<1x20x128xbf16> to vector<20x128xbf16>
    %9 = vector.broadcast %5 : vector<20x1xbf16> to vector<20x128xbf16>
    %10 = arith.mulf %8, %9 : vector<20x128xbf16>
    %c0_3 = arith.constant 0 : index
    %c0_4 = arith.constant 0 : index
    %11 = vector.load %arg9[%c0_3, %c0_4] : memref<24x128xbf16, #tpu.memory_space<vmem>>, vector<20x128xbf16>
    tpu.vector_store %arg9[%c0_3, %c0_4], %10 {strides = array<i32>} : memref<24x128xbf16, #tpu.memory_space<vmem>>, vector<20x128xbf16>,
    %c0_5 = arith.constant 0 : index
    %c0_6 = arith.constant 0 : index
    %12 = vector.load %arg9[%c0_5, %c0_6] : memref<24x128xbf16, #tpu.memory_space<vmem>>, vector<18x128xbf16>
    %c0_7 = arith.constant 0 : index
    %c0_8 = arith.constant 0 : index
    %13 = vector.load %arg4[%c0_7, %c0_8] : memref<384x128xbf16, #tpu.memory_space<vmem>>, vector<128x128xbf16>
    %cst = arith.constant dense<0.000000e+00> : vector<18x128xf32>
    %14 = tpu.matmul %12, %13, %cst {dimension_numbers = #tpu.dot_dimension_numbers<[1], [0], [0], [1], [0, 0, 1, 1], [], []>} : vector<18x128xbf16>, vector<128x128xbf16>, vector<18x128xf32> -> vector<18x128xf32>
    %c1 = arith.constant 1 : index
    %c0_9 = arith.constant 0 : index
    %15 = vector.load %arg9[%c1, %c0_9] : memref<24x128xbf16, #tpu.memory_space<vmem>>, vector<18x128xbf16>
    %c128 = arith.constant 128 : index
    %c0_10 = arith.constant 0 : index
    %16 = vector.load %arg4[%c128, %c0_10] : memref<384x128xbf16, #tpu.memory_space<vmem>>, vector<128x128xbf16>
    %cst_11 = arith.constant dense<0.000000e+00> : vector<18x128xf32>
    %17 = tpu.matmul %15, %16, %cst_11 {dimension_numbers = #tpu.dot_dimension_numbers<[1], [0], [0], [1], [0, 0, 1, 1], [], []>} : vector<18x128xbf16>, vector<128x128xbf16>, vector<18x128xf32> -> vector<18x128xf32>
    %18 = arith.addf %14, %17 : vector<18x128xf32>
    %c2 = arith.constant 2 : index
    %c0_12 = arith.constant 0 : index
    %19 = vector.load %arg9[%c2, %c0_12] : memref<24x128xbf16, #tpu.memory_space<vmem>>, vector<18x128xbf16>
    %c256 = arith.constant 256 : index
    %c0_13 = arith.constant 0 : index
    %20 = vector.load %arg4[%c256, %c0_13] : memref<384x128xbf16, #tpu.memory_space<vmem>>, vector<128x128xbf16>
    %cst_14 = arith.constant dense<0.000000e+00> : vector<18x128xf32>
    %21 = tpu.matmul %19, %20, %cst_14 {dimension_numbers = #tpu.dot_dimension_numbers<[1], [0], [0], [1], [0, 0, 1, 1], [], []>} : vector<18x128xbf16>, vector<128x128xbf16>, vector<18x128xf32> -> vector<18x128xf32>
    %22 = arith.addf %18, %21 : vector<18x128xf32>
    %c0_15 = arith.constant 0 : index
    %c0_16 = arith.constant 0 : index
    %23 = vector.load %arg5[%c0_15, %c0_16] : memref<1x128xf32, #tpu.memory_space<vmem>>, vector<1x128xf32>
    %24 = vector.broadcast %23 : vector<1x128xf32> to vector<18x128xf32>
    %25 = arith.addf %22, %24 : vector<18x128xf32>
    %26 = arith.mulf %25, %25 : vector<18x128xf32>
    %27 = arith.mulf %25, %26 : vector<18x128xf32>
    %cst_17 = arith.constant 4.471500e-02 : f32
    %28 = vector.broadcast %cst_17 : f32 to vector<18x128xf32>
    %29 = arith.mulf %28, %27 : vector<18x128xf32>
    %30 = arith.addf %25, %29 : vector<18x128xf32>
    %cst_18 = arith.constant 0.797884583 : f32
    %31 = vector.broadcast %cst_18 : f32 to vector<18x128xf32>
    %32 = arith.mulf %31, %30 : vector<18x128xf32>
    %33 = math.tanh %32 : vector<18x128xf32>
    %cst_19 = arith.constant 1.000000e+00 : f32
    %34 = vector.broadcast %cst_19 : f32 to vector<18x128xf32>
    %35 = arith.addf %34, %33 : vector<18x128xf32>
    %cst_20 = arith.constant 5.000000e-01 : f32
    %36 = vector.broadcast %cst_20 : f32 to vector<18x128xf32>
    %37 = arith.mulf %36, %35 : vector<18x128xf32>
    %38 = arith.mulf %25, %37 : vector<18x128xf32>
    %c1_i32 = arith.constant 1 : i32
    %39 = arith.addi %1, %c1_i32 : i32
    %c0_21 = arith.constant 0 : index
    %40 = arith.index_cast %39 : i32 to index
    %c0_22 = arith.constant 0 : index
    %41 = vector.load %arg3[%c0_21, %40, %c0_22] : memref<1x24x1xf32, #tpu.memory_space<vmem>>, vector<1x18x1xf32>
    %42 = vector.shape_cast %41 : vector<1x18x1xf32> to vector<18x1xf32>
    %43 = arith.truncf %42 : vector<18x1xf32> to vector<18x1xbf16>
    %44 = arith.truncf %38 : vector<18x128xf32> to vector<18x128xbf16>
    %45 = vector.broadcast %43 : vector<18x1xbf16> to vector<18x128xbf16>
    %46 = arith.mulf %44, %45 : vector<18x128xbf16>
    %c0_23 = arith.constant 0 : index
    %c0_24 = arith.constant 0 : index
    %47 = vector.load %arg10[%c0_23, %c0_24] : memref<24x128xbf16, #tpu.memory_space<vmem>>, vector<18x128xbf16>
    tpu.vector_store %arg10[%c0_23, %c0_24], %46 {strides = array<i32>} : memref<24x128xbf16, #tpu.memory_space<vmem>>, vector<18x128xbf16>,
    %c0_25 = arith.constant 0 : index
    %c0_26 = arith.constant 0 : index
    %48 = vector.load %arg10[%c0_25, %c0_26] : memref<24x128xbf16, #tpu.memory_space<vmem>>, vector<16x128xbf16>
    %c0_27 = arith.constant 0 : index
    %c0_28 = arith.constant 0 : index
    %49 = vector.load %arg6[%c0_27, %c0_28] : memref<384x128xbf16, #tpu.memory_space<vmem>>, vector<128x128xbf16>
    %cst_29 = arith.constant dense<0.000000e+00> : vector<16x128xf32>
    %50 = tpu.matmul %48, %49, %cst_29 {dimension_numbers = #tpu.dot_dimension_numbers<[1], [0], [0], [1], [0, 0, 1, 1], [], []>} : vector<16x128xbf16>, vector<128x128xbf16>, vector<16x128xf32> -> vector<16x128xf32>
    %c1_30 = arith.constant 1 : index
    %c0_31 = arith.constant 0 : index
    %51 = vector.load %arg10[%c1_30, %c0_31] : memref<24x128xbf16, #tpu.memory_space<vmem>>, vector<16x128xbf16>
    %c128_32 = arith.constant 128 : index
    %c0_33 = arith.constant 0 : index
    %52 = vector.load %arg6[%c128_32, %c0_33] : memref<384x128xbf16, #tpu.memory_space<vmem>>, vector<128x128xbf16>
    %cst_34 = arith.constant dense<0.000000e+00> : vector<16x128xf32>
    %53 = tpu.matmul %51, %52, %cst_34 {dimension_numbers = #tpu.dot_dimension_numbers<[1], [0], [0], [1], [0, 0, 1, 1], [], []>} : vector<16x128xbf16>, vector<128x128xbf16>, vector<16x128xf32> -> vector<16x128xf32>
    %54 = arith.addf %50, %53 : vector<16x128xf32>
    %c2_35 = arith.constant 2 : index
    %c0_36 = arith.constant 0 : index
    %55 = vector.load %arg10[%c2_35, %c0_36] : memref<24x128xbf16, #tpu.memory_space<vmem>>, vector<16x128xbf16>
    %c256_37 = arith.constant 256 : index
    %c0_38 = arith.constant 0 : index
    %56 = vector.load %arg6[%c256_37, %c0_38] : memref<384x128xbf16, #tpu.memory_space<vmem>>, vector<128x128xbf16>
    %cst_39 = arith.constant dense<0.000000e+00> : vector<16x128xf32>
    %57 = tpu.matmul %55, %56, %cst_39 {dimension_numbers = #tpu.dot_dimension_numbers<[1], [0], [0], [1], [0, 0, 1, 1], [], []>} : vector<16x128xbf16>, vector<128x128xbf16>, vector<16x128xf32> -> vector<16x128xf32>
    %58 = arith.addf %54, %57 : vector<16x128xf32>
    %c0_40 = arith.constant 0 : index
    %c0_41 = arith.constant 0 : index
    %59 = vector.load %arg7[%c0_40, %c0_41] : memref<1x128xf32, #tpu.memory_space<vmem>>, vector<1x128xf32>
    %60 = vector.broadcast %59 : vector<1x128xf32> to vector<16x128xf32>
    %61 = arith.addf %58, %60 : vector<16x128xf32>
    %c2_i32 = arith.constant 2 : i32
    %62 = arith.addi %1, %c2_i32 : i32
    %c0_42 = arith.constant 0 : index
    %63 = arith.index_cast %62 : i32 to index
    %c0_43 = arith.constant 0 : index
    %64 = vector.load %arg3[%c0_42, %63, %c0_43] : memref<1x24x1xf32, #tpu.memory_space<vmem>>, vector<1x16x1xf32>
    %65 = vector.shape_cast %64 : vector<1x16x1xf32> to vector<16x1xf32>
    %66 = vector.broadcast %65 : vector<16x1xf32> to vector<16x128xf32>
    %67 = arith.mulf %61, %66 : vector<16x128xf32>
    %c0_44 = arith.constant 0 : index
    %c0_45 = arith.constant 0 : index
    %c0_46 = arith.constant 0 : index
    %68 = vector.load %arg8[%c0_44, %c0_45, %c0_46] : memref<1x16x128xf32, #tpu.memory_space<vmem>>, vector<1x16x128xf32>
    %69 = vector.shape_cast %68 : vector<1x16x128xf32> to vector<16x128xf32>
    %70 = vector.shape_cast %67 : vector<16x128xf32> to vector<1x16x128xf32>
    tpu.vector_store %arg8[%c0_44, %c0_45, %c0_46], %70 {strides = array<i32>} : memref<1x16x128xf32, #tpu.memory_space<vmem>>, vector<1x16x128xf32>,
    return
  }
  func.func @transform_0(%arg0: i32, %arg1: i32) -> (i32, i32, i32) {
    %c0_i32 = arith.constant 0 : i32
    %c0_i32_0 = arith.constant 0 : i32
    %c0_i32_1 = arith.constant 0 : i32
    return %arg0, %c0_i32, %c0_i32_0 : i32, i32, i32
  }
  func.func @transform_1(%arg0: i32, %arg1: i32) -> (i32, i32, i32) {
    %c0_i32 = arith.constant 0 : i32
    %c0_i32_0 = arith.constant 0 : i32
    %c0_i32_1 = arith.constant 0 : i32
    return %arg0, %c0_i32, %c0_i32_0 : i32, i32, i32
  }
  func.func @transform_2(%arg0: i32, %arg1: i32) -> (i32, i32) {
    %c0_i32 = arith.constant 0 : i32
    %c0_i32_0 = arith.constant 0 : i32
    %c0_i32_1 = arith.constant 0 : i32
    return %c0_i32, %c0_i32_0 : i32, i32
  }
  func.func @transform_3(%arg0: i32, %arg1: i32) -> (i32, i32) {
    %c0_i32 = arith.constant 0 : i32
    %c0_i32_0 = arith.constant 0 : i32
    %c0_i32_1 = arith.constant 0 : i32
    return %c0_i32, %c0_i32_0 : i32, i32
  }
  func.func @transform_4(%arg0: i32, %arg1: i32) -> (i32, i32) {
    %c0_i32 = arith.constant 0 : i32
    %c0_i32_0 = arith.constant 0 : i32
    %c0_i32_1 = arith.constant 0 : i32
    return %c0_i32, %c0_i32_0 : i32, i32
  }
  func.func @transform_5(%arg0: i32, %arg1: i32) -> (i32, i32) {
    %c0_i32 = arith.constant 0 : i32
    %c0_i32_0 = arith.constant 0 : i32
    %c0_i32_1 = arith.constant 0 : i32
    return %c0_i32, %c0_i32_0 : i32, i32
  }
  func.func @transform_6(%arg0: i32, %arg1: i32) -> (i32, i32, i32) {
    %c0_i32 = arith.constant 0 : i32
    %c0_i32_0 = arith.constant 0 : i32
    return %arg0, %arg1, %c0_i32 : i32, i32, i32
  }
}

</mosaic_0001>

<bundles_post_ra>
// kernel: tpu_custom_call.1
= control target key start
LH: loop header
LB: loop body
LE: loop exit
PB: predicated region body
PF: predicated region fallthrough
CT: control target
= control target key end

     0   :  { %11 = vsyncpa [#allocation5], 0  ;;  %s2203_s0 = inlined_call_operand.vmem [shape: bf16[2,24,128], index: 0, kind: input, shape index: {}]   ;;  %s2204_s1 = inlined_call_operand.vmem [shape: f32[2,24,1], index: 1, kind: input, shape index: {}]   ;;  %s2205_s2 = inlined_call_operand.hbm [shape: bf16[384,128], index: 2, kind: input, shape index: {}]   ;;  %s2206_s3 = inlined_call_operand.vmem [shape: f32[1,128], index: 3, kind: input, shape index: {}]   ;;  %s2207_s4 = inlined_call_operand.hbm [shape: bf16[384,128], index: 4, kind: input, shape index: {}]   ;;  %s2208_s5 = inlined_call_operand.vmem [shape: f32[1,128], index: 5, kind: input, shape index: {}]   ;;  %s2209_s6 = inlined_call_operand.hbm [shape: f32[2,16,128], index: 6, kind: output, shape index: {}]  }
   0x1   :  { %12 = vsyncpa [#allocation8], 0 }
   0x2   :  { %13 = vsyncpa [#allocation6], 0 }
   0x3   :  { %15 = vsyncpa [#allocation6 + $0x1], 0  ;;  %s1952_s21 = smov 0   ;;  %s1954_s22 = smov 0  }
   0x4   :  { %s1956_s23 = smov 0   ;;  %s1958_s24 = smov 0  }
   0x5   :  { %s1960_s25 = smov 0   ;;  %s1962_s26 = smov 0  }
   0x6 LB: > { %2216 = sst [smem:[#allocation13_spill]] %s1899_s25  ;;  %s1343_s27 = sadd.s32 4294967295, %s1903_s26   ;;  %s1903_s26 = sphi %s1962_s26, %s21_s26   ;;  %s1899_s25 = sphi %s1960_s25, %s2228_s25   ;;  %s1895_s24 = sphi %s1958_s24, %s2227_s24   ;;  %s1891_s23 = sphi %s1956_s23, %s2231_s23   ;;  %s1887_s22 = sphi %s1954_s22, %s2230_s22   ;;  %s1883_s21 = sphi %s1952_s21, %s2229_s21  }
   0x7   : > { %s1344_s28 = sadd.s32 4294967294, %s1903_s26   ;;  %s33_s29 = sadd.s32 1, %s1899_s25 }
   0x8   : > { %s178_s30 = sadd.s32 1, %s1891_s23  ;;  %p35_p0 = scmp.ge.s32.totalorder %s33_s29, 2 }
   0x9   : > { %p188_p1 = scmp.ne.s32.totalorder %s1891_s23, %s1887_s22  ;;  %p189_p2 = scmp.eq.s32.totalorder %s1343_s27, 1 }
   0xa   : > { %p194_p3 = scmp.ne.s32.totalorder %s1887_s22, %s1883_s21  ;;  %s2233_s29 = smov (%p35_p0, %s33_s29), 0 }
   0xb   : > { %2217 = sst [smem:[#allocation14_spill]] %s2233_s29  ;;  %p1992_p4 = por %p189_p2, %p188_p1 }
   0xc   : > { %p195_p5 = scmp.eq.s32.totalorder %s1344_s28, 1  ;;  %s173_s8 = ssub.s32 %s1899_s25, %s2233_s29 }
   0xd   : > { %s2218_s7 = scalar_select %p1992_p4, 1, 0 }
   0xe   : > { %p1345_p6 = scmp.ge.s32.totalorder %s1903_s26, 1  ;;  %p176_p7 = scmp.eq.s32.totalorder %s173_s8, 0 }
   0xf   : > { %p1999_p8 = por %p195_p5, %p194_p3  ;;  %p202_p9 = scmp.lt.s32.totalorder %s1903_s26, 3 }
  0x10   : > { %s2005_s10 = scalar_select %p176_p7, %s1891_s23, %s178_s30  }
  0x11   : > { %s2219_s9 = scalar_select %p1999_p8, 1, 0 }
  0x12   : > { %p2007_p10 = pnand %p1345_p6, %p202_p9  ;;  %p2011_p11 = scmp.eq.s32.totalorder %s1343_s27, 0 }
  0x13   : > { %s1905_s13 = smov [#allocation4]   ;;  %s1906_s16 = smov [#allocation7]  }
  0x14   : > { %s2220_s11 = scalar_select %p2007_p10, 1, 0 }
  0x15   : > { %s2221_s12 = scalar_select %p2011_p11, 1, 0 }
  0x16   : > { %p1622_p12 = pneg %p2007_p10  ;;  %s214_s14 = sshll.u32 %s1905_s13, 4  ;;  %s215_s14 = int_to_ptr.vmem [resolvable:$true] %s214_s14 }
  0x17   : > { %s230_s17 = sshll.u32 %s1906_s16, 4  ;;  %s1761_s20 = scalar_lea.hbm %s2205_s2, 3072  ;;  %s2023_s17 = int_to_ptr.vmem [resolvable:$true] %s230_s17 }
  0x18   : > { %p2019_p13 = pnand %p2011_p11, %p1622_p12  ;;  %p1762_p0 = scmp.ne.s32.totalorder %s2205_s2, %s1761_s20 }
  0x19   : > { %p1768_p5 = scmp.lt.u32.totalorder %s1761_s20, %s2205_s2 }
  0x1a   : > { %p1763_p1 = pneg %p2019_p13 }
  0x1c   : > { %p1764_p2 = pnand %p1763_p1, %p1762_p0 }
  0x1e   : > { %p1765_p3 = pneg %p1764_p2 }
  0x20   : > { %p1770_p6 = pnand %p1768_p5, %p1765_p3 }
  0x22   : > { %1773 = shalt.err (!%p1770_p6)
}
  0x23   : > { %s1774_s13 = scalar_lea.vmem %s215_s14, 3072  ;;  %p1782_p8 = scmp.lt.s32.totalorder %s215_s14, %s215_s14 }
  0x24   : > { %p1775_p7 = scmp.ne.s32.totalorder %s215_s14, %s1774_s13  ;;  %p1783_p4 = scmp.lt.s32.totalorder %s1774_s13, %s1774_s13 }
  0x26   : > { %p1777_p9 = pnand %p1775_p7, %p1763_p1  ;;  %p1784_p11 = por %p1783_p4, %p1782_p8 }
  0x28   : > { %p1778_p12 = pneg %p1777_p9 }
  0x2a   : > { %p1785_p10 = pnand %p1784_p11, %p1778_p12 }
  0x2c   : > { %1788 = shalt.err (!%p1785_p10)
}
  0x2d   : > { %s1907_s16 = smov 64   ;;  %s1908_s18 = smov 4  }
  0x2e   : > { %1625 = dma.hbm_to_vmem [thread:$0]  (!%p2019_p13), %s2205_s2, 3072, %s215_s14, [#allocation5], %s1907_s16, %s1907_s16, %s1908_s18  }
  0x2f   : > { %s1789_s30 = scalar_lea.hbm %s2207_s4, 3072 }
  0x30   : > { %p1790_p0 = scmp.ne.s32.totalorder %s2207_s4, %s1789_s30  ;;  %p1796_p10 = scmp.lt.u32.totalorder %s1789_s30, %s2207_s4 }
  0x32   : > { %p1792_p4 = pnand %p1790_p0, %p1763_p1 }
  0x34   : > { %p1793_p8 = pneg %p1792_p4 }
  0x36   : > { %p1798_p11 = pnand %p1796_p10, %p1793_p8 }
  0x38   : > { %1801 = shalt.err (!%p1798_p11)
}
  0x39   : > { %s1802_s14 = scalar_lea.vmem %s2023_s17, 3072  ;;  %p1810_p6 = scmp.lt.s32.totalorder %s2023_s17, %s2023_s17 }
  0x3a   : > { %p1803_p2 = scmp.ne.s32.totalorder %s2023_s17, %s1802_s14  ;;  %p1811_p7 = scmp.lt.s32.totalorder %s1802_s14, %s1802_s14 }
  0x3c   : > { %p1805_p3 = pnand %p1803_p2, %p1763_p1  ;;  %p1812_p9 = por %p1811_p7, %p1810_p6 }
  0x3e   : > { %p1806_p5 = pneg %p1805_p3 }
  0x40   : > { %p1813_p12 = pnand %p1812_p9, %p1806_p5 }
  0x42   : > { %1816 = shalt.err (!%p1813_p12)
}
  0x43   : > { %1628 = dma.hbm_to_vmem [thread:$0]  (!%p2019_p13), %s2207_s4, 3072, %s2023_s17, [#allocation8], %s1907_s16, %s1907_s16, %s1908_s18  }
  0x44   : > { %p2223_p0 = scmp.ne.s32.totalorder %s2220_s11, 0 }
  0x45   : > { %p2224_p4 = scmp.ne.s32.totalorder (!%p2223_p0), %s2221_s12, 0 }
  0x46   : > { %265 = sbr.rel (%p2223_p0) target bundleno = 811 (0x32b), region = 44 }
  0x4d   : > { %1870 = dma.done.wait (%p2224_p4), [#allocation5], 3072  }
  0x4e   : > { %1872 = vsyncadd (%p2224_p4), [#allocation5], 4294964224 }
  0x4f   : > { %1874 = dma.done.wait (%p2224_p4), [#allocation8], 3072  }
  0x50   : > { %1876 = vsyncadd (%p2224_p4), [#allocation8], 4294964224  ;;  %p304_p1 = scmp.lt.s32.totalorder %s1895_s24, 1  ;;  %v1909_v0 = vmov 0   ;;  %v1699_v5 = vld [vmem:[#allocation4] sm:$0xff]   ;;  %v1700_v7 = vld [vmem:[#allocation4 + $0x8] sm:$0xff]   ;;  %v343_v32 = vlaneseq }
  0x51   : > { %1697 = vset.pattern.permute.xlu0 %v1909_v0  ;;  %1698 = vset.pattern.permute.xlu1 %v1909_v0  ;;  %v1701_v8 = vld [vmem:[#allocation4 + $0x40] sm:$0xff]   ;;  %v1702_v9 = vld [vmem:[#allocation4 + $0x10] sm:$0xff]   ;;  %v1703_v10 = vld [vmem:[#allocation4 + $0x48] sm:$0xff]   ;;  %v1910_v30 = vmov 839922192   ;;  %vm649_vm1 = vcmask 1046528  }
  0x52   : > { %s2084_s11 = scalar_select %p304_p1, %s1895_s24, 1  ;;  %1510 = vmatprep.subr.bf16.mxu1 %v1699_v5  ;;  %1490 = vmatprep.subr.bf16.mxu0 %v1701_v8  ;;  %v1705_v12 = vld [vmem:[#allocation4 + $0x50] sm:$0xff]   ;;  %v1704_v13 = vld [vmem:[#allocation4 + $0x18] sm:$0xff]   ;;  %v1706_v15 = vld [vmem:[#allocation4 + $0x20] sm:$0xff]   ;;  %v341_v31 = vunpack.c.l.s4 %v1910_v30  ;;  %v1911_v33 = vmov 1985246804  }
  0x53   : > { %1511 = vmatpush3.bf16.msra.mxu1 %v1699_v5  ;;  %1491 = vmatpush3.bf16.msra.mxu0 %v1701_v8  ;;  %v1707_v14 = vld [vmem:[#allocation4 + $0x58] sm:$0xff]   ;;  %v1709_v16 = vld [vmem:[#allocation4 + $0x60] sm:$0xff]   ;;  %v1708_v17 = vld [vmem:[#allocation4 + $0x28] sm:$0xff]   ;;  %v348_v34 = vunpack.c.l.s4 %v1911_v33  ;;  %v344_v36 = vshrl.u32 %v343_v32, 7  ;;  %vm414_vm0 = vsmask.f32 7424 }
  0x54   : > { %s1611_s15 = smul.u32 24, %s2084_s11  ;;  %1512 = vmatprep.subr.bf16.mxu1 %v1700_v7  ;;  %1492 = vmatprep.subr.bf16.mxu0 %v1703_v10  ;;  %v1710_v18 = vld [vmem:[#allocation4 + $0x30] sm:$0xff]   ;;  %v1711_v19 = vld [vmem:[#allocation4 + $0x68] sm:$0xff]   ;;  %v1712_v21 = vld [vmem:[#allocation4 + $0x38] sm:$0xff]   ;;  %v342_v35 = vunpack.c.0.s8 %v341_v31  ;;  %vm1913_vm2 = vmmov 0   ;;  %s301_s8 = sand.u32 1, %s1887_s22  }
  0x55   : > { %v1713_v20 = vld [vmem:[#allocation4 + $0x70] sm:$0xff]   ;;  %v1717_v22 = vld [vmem:[#allocation4 + $0x78] sm:$0xff]   ;;  %v2096_v23 = vld [vmem:[#allocation4 + $0x80] sm:$0xff]   ;;  %s1610_s12 = smul.u32 12, %s2084_s11  ;;  %v349_v37 = vunpack.c.0.s8 %v348_v34  ;;  %s1352_s13 = sshll.u32 %s301_s8, 4 }
  0x56   : > { %s2090_s18 = scalar_lea.vmem %s2204_s1, %s1611_s15  ;;  %v345_v38 = vsub.s32 %v342_v35, %v344_v36  ;;  %v1721_v8 = vld [vmem:[#allocation4 + $0x90] sm:$0xff]   ;;  %v1743_v30 = vld [vmem:[#allocation7 + $0x78] sm:$0xff]   ;;  %s303_s29 = scalar_lea.vmem [#allocation9], %s1352_s13 }
  0x57   : > { %v318_v1 = vld [vmem:[%s2090_s18] sm:$0xff]  ;;  %v319_v2 = vld [vmem:[%s2090_s18 + $0x8] sm:$0xff]  ;;  %v320_v3 = vld [vmem:[%s2090_s18 + $0x10] sm:$0xf]  ;;  %1513 = vmatpush3.bf16.msra.mxu1 %v1700_v7  ;;  %1493 = vmatpush3.bf16.msra.mxu0 %v1703_v10  ;;  %s308_s27 = scalar_lea.vmem %s2203_s0, %s1610_s12  ;;  %v352_v39 = vsub.s32 %v349_v37, %v344_v36  ;;  %s1226_s11 = sshll.u32 %s303_s29, 4  ;;  %s2150_s11 = int_to_ptr.vmem [resolvable:$true] %s1226_s11 }
  0x58   : > { %v321_v4 = vpack.c.bf16 %v319_v2, %v318_v1  ;;  %v322_v6 = vpack.c.bf16 %v320_v3, %v320_v3  ;;  %v1419_v11 = vld [vmem:[%s2090_s18 + $0x2] sm:$0xff]  ;;  %1514 = vmatprep.subr.bf16.mxu1 %v1702_v9  ;;  %1494 = vmatprep.subr.bf16.mxu0 %v1705_v12  ;;  %v1386_v26 = vld [vmem:[%s2090_s18 + $0x11] sm:$0x3]  ;;  %v1723_v10 = vld [vmem:[#allocation4 + $0xa0] sm:$0xff]   ;;  %s1426_s15 = sshll.u32 %s1895_s24, 8  ;;  %s2157_s12 = scalar_lea.sflag [#allocation6], %s301_s8 }
  0x59   : > { %v1384_v24 = vld [vmem:[%s2090_s18 + $0x1] sm:$0xff]  ;;  %v1385_v25 = vld [vmem:[%s2090_s18 + $0x9] sm:$0xff]  ;;  %v797_v28 = vpack.c.bf16 %v1386_v26, %v1386_v26  ;;  %s1817_s24 = scalar_lea.vmem %s2150_s11, 256  ;;  %p2225_p8 = scmp.ne.s32.totalorder %s2218_s7, 0 }
  0x5a   : > { %332 = vperm.xlu0 %1697, %v321_v4   ;;  %v796_v27 = vpack.c.bf16 %v1385_v25, %v1384_v24  ;;  %v1420_v29 = vld [vmem:[%s2090_s18 + $0xa] sm:$0xff]  ;;  %v327_v40 = vld [vmem:[%s308_s27] sm:$0xf]  ;;  %v328_v41 = vld [vmem:[%s308_s27 + $0x4] sm:$0xf]  ;;  %s2155_s18 = scalar_lea.hbm %s2209_s6, %s1426_s15  ;;  %p1818_p13 = scmp.ne.s32.totalorder %s2150_s11, %s1817_s24 }
  0x5b   : > { %1515 = vmatpush3.bf16.msra.mxu1 %v1702_v9  ;;  %1495 = vmatpush3.bf16.msra.mxu0 %v1705_v12  ;;  %v329_v47 = vld [vmem:[%s308_s27 + $0x8] sm:$0x3]  ;;  %v1722_v9 = vld [vmem:[#allocation4 + $0x98] sm:$0xff]   ;;  %v1736_v24 = vld [vmem:[#allocation7 + $0x28] sm:$0xff]   ;;  %s1914_s19 = smov [#allocation9]  }
  0x5c   : > { %1516 = vmatprep.subr.bf16.mxu1 %v1704_v13  ;;  %1496 = vmatprep.subr.bf16.mxu0 %v1707_v14  ;;  %v1725_v12 = vld [vmem:[#allocation4 + $0xb0] sm:$0xff]   ;;  %v1737_v25 = vld [vmem:[#allocation7 + $0x60] sm:$0xff]   ;;  %p1819_p10 = pnand %p1818_p13, %p2225_p8  ;;  %s1821_s20 = sshll.u32 %s1914_s19, 4  ;;  %s1822_s20 = int_to_ptr.vmem [resolvable:$false] %s1821_s20 }
  0x5d   : > { %802 = vperm.xlu1 %1698, %v796_v27   ;;  %v1738_v26 = vld [vmem:[#allocation7 + $0x30] sm:$0xff]   ;;  %v1739_v27 = vld [vmem:[#allocation7 + $0x68] sm:$0xff]   ;;  %s1823_s27 = scalar_lea.vmem %s1822_s20, 512  ;;  %p1824_p2 = scmp.lt.s32.totalorder %s2150_s11, %s1822_s20 }
  0x5e   : > { %336 = vperm.xlu0 %1697, %v322_v6   ;;  %v1720_v6 = vld [vmem:[#allocation4 + $0x88] sm:$0xff]   ;;  %p1820_p11 = pneg %p1819_p10  ;;  %p1825_p3 = scmp.lt.s32.totalorder %s1823_s27, %s1817_s24 }
  0x5f   : > { %1517 = vmatpush3.bf16.msra.mxu1 %v1704_v13  ;;  %1497 = vmatpush3.bf16.msra.mxu0 %v1707_v14  ;;  %v1726_v13 = vld [vmem:[#allocation4 + $0xb8] sm:$0xff]   ;;  %v1727_v14 = vld [vmem:[#allocation7] sm:$0xff]  }
  0x60   : > { %1518 = vmatprep.subr.bf16.mxu1 %v1706_v15  ;;  %1498 = vmatprep.subr.bf16.mxu0 %v1709_v16  ;;  %p1826_p5 = por %p1825_p3, %p1824_p2 }
  0x61   : > { %807 = vperm.xlu1 %1698, %v797_v28   ;;  %v1740_v28 = vld [vmem:[#allocation7 + $0x38] sm:$0xff]  }
  0x62   : > { %1198 = vperm.xlu0 %1697, %v1419_v11   ;;  %v1724_v11 = vld [vmem:[#allocation4 + $0xa8] sm:$0xff]   ;;  %p1827_p6 = pnand %p1826_p5, %p1820_p11 }
  0x63   : > { %1519 = vmatpush3.bf16.msra.mxu1 %v1706_v15  ;;  %1499 = vmatpush3.bf16.msra.mxu0 %v1709_v16  ;;  %v1912_v15 = vmov 0.0   ;;  %v1728_v16 = vld [vmem:[#allocation7 + $0x8] sm:$0xff]  }
  0x64   : > { %1520 = vmatprep.subr.bf16.mxu1 %v1708_v17  ;;  %1500 = vmatprep.subr.bf16.mxu0 %v1711_v19 }
  0x65   : > { %1203 = vperm.xlu1 %1698, %v1420_v29   ;;  %v1741_v29 = vld [vmem:[#allocation7 + $0x70] sm:$0xff]  }
  0x67   : > { %1521 = vmatpush3.bf16.msra.mxu1 %v1708_v17  ;;  %1501 = vmatpush3.bf16.msra.mxu0 %v1711_v19  ;;  %v1729_v17 = vld [vmem:[#allocation7 + $0x40] sm:$0xff]   ;;  %v1731_v19 = vld [vmem:[#allocation7 + $0x48] sm:$0xff]  }
  0x68   : > { %1522 = vmatprep.subr.bf16.mxu1 %v1710_v18  ;;  %1502 = vmatprep.subr.bf16.mxu0 %v1713_v20 }
  0x6b   : > { %1523 = vmatpush3.bf16.msra.mxu1 %v1710_v18  ;;  %1503 = vmatpush3.bf16.msra.mxu0 %v1713_v20  ;;  %v1730_v18 = vld [vmem:[#allocation7 + $0x10] sm:$0xff]   ;;  %v1732_v20 = vld [vmem:[#allocation7 + $0x18] sm:$0xff]  }
  0x6c   : > { %1524 = vmatprep.subr.bf16.mxu1 %v1712_v21  ;;  %1504 = vmatprep.subr.bf16.mxu0 %v1717_v22 }
  0x6f   : > { %1525 = vmatpush3.bf16.msra.mxu1 %v1712_v21  ;;  %1505 = vmatpush3.bf16.msra.mxu0 %v1717_v22  ;;  %v1733_v21 = vld [vmem:[#allocation7 + $0x50] sm:$0xff]   ;;  %v1734_v22 = vld [vmem:[#allocation7 + $0x20] sm:$0xff]  }
  0x70   : > { %1530 = vmatprep.subr.bf16.mxu0 %v2096_v23  ;;  %1550 = vmatprep.subr.bf16.mxu1 %v1912_v15 }
  0xd9   : > { %v333_v42 = vpop.permute.xlu0 %332 }
  0xda   : > { %v346_v43 = vrot.slane %v333_v42, %v345_v38  ;;  %v353_v44 = vrot.slane %v333_v42, %v352_v39 }
  0xdc   : > { %v364_v45 = vmul.bf16 %v346_v43, %v327_v40  ;;  %v365_v46 = vmul.bf16 %v353_v44, %v328_v41  ;;  %v1383_v43 = vld [vmem:[%s2206_s3] ss:$0 sm:$0xff] }
  0xdd   : > { %v337_v48 = vpop.permute.xlu0 %336 }
  0xde   : > { %v1432_v49 = vcombine.low %v364_v45, %v365_v46  ;;  %v360_v50 = vrot.slane %v337_v48, %v345_v38 }
  0xe0   : > { %1431 = vst [vmem:[#allocation2] sm:$0xff] %v1432_v49   ;;  %v366_v51 = vmul.bf16 %v360_v50, %v329_v47 }
  0xe2   : > { %369 = vst [vmem:[#allocation2 + $0x8] sm:$0x3] %v366_v51 }
  0xe7   : > { %v370_v52 = vld [vmem:[#allocation2] sm:$0xf]  ;;  %v371_v53 = vld [vmem:[#allocation2 + $0x4] sm:$0xf] }
  0xe8   : > { %v1355_v54 = vcombine.low %v370_v52, %v371_v53  ;;  %v629_v55 = vld [vmem:[#allocation2] sm:$0xe] }
  0xe9   : > { %v1716_v56 = vld [vmem:[#allocation2 + $0x8] ss:$0 sps:$4 sm:$0x11]   ;;  %v1374_v58 = vcombine.low %v629_v55, %v371_v53 }
  0xea   : > { %1526 = vmatprep.mubr.bf16.mxu1 %v1355_v54  ;;  %v1718_v57 = vld [vmem:[#allocation2 + $0x8] ss:$0 sps:$4 sm:$0x33]   ;;  %v418_v59 = vshll.u32 %v1355_v54, 16  ;;  %v416_v61 = vshrl.u32 %v1355_v54, 16 }
  0xeb   : > { %1527 = vmatmul.mubr.bf16.vlgmr.msra.gmra.mrb[0].mxu1 %v1716_v56  ;;  %v423_v60 = vshll.u32 %v1718_v57, 16  ;;  %v427_v0 = vshrl.u32 %v1718_v57, 16  ;;  %v650_v2 = vrot.slane %v1374_v58, 1  ;;  %v651_v3 = vrot.slane %v1718_v57, 1 }
  0xec   : > { %v420_v62 = vrot.slane %v418_v59, 1  ;;  %1551 = vmatpush3.bf16.msra.mxu1 %v1729_v17  ;;  %1566 = vmatprep.mubr.msk.bf16.mxu1 %vm1913_vm2, %v1912_v15 }
  0xed   : > { %v425_v63 = vrot.slane %v423_v60, 1  ;;  %v652_v7 = vsel %vm649_vm1, %v650_v2, %v651_v3  ;;  %1552 = vmatprep.subr.bf16.mxu1 %v1912_v15 }
  0xee   : > { %v421_v1 = vor.u32 %v420_v62, %v416_v61 }
  0xef   : > { %v429_v4 = vor.u32 %v427_v0, %v425_v63 }
  0xf0   : > { %v426_v5 = vsel %vm414_vm0, %v421_v1, %v425_v63  ;;  %1553 = vmatpush3.bf16.msra.mxu1 %v1731_v19 }
  0xf1   : > { %1506 = vmatprep.mubr.bf16.mxu0 %v426_v5  ;;  %1554 = vmatprep.subr.bf16.mxu1 %v1912_v15 }
  0xf2   : > { %1507 = vmatmul.mubr.bf16.vlgmr.msra.gmra.mrb[0].mxu0 %v429_v4 }
  0xf3   : > { %1531 = vmatpush3.bf16.msra.mxu0 %v2096_v23  ;;  %1546 = vmatprep.mubr.bf16.mxu0 %v652_v7  ;;  %v1735_v23 = vld [vmem:[#allocation7 + $0x58] sm:$0xff]   ;;  %v803_v7 = vpop.permute.xlu1 %802 }
  0xf4   : > { %1532 = vmatprep.subr.bf16.mxu0 %v1720_v6  ;;  %1555 = vmatpush3.bf16.msra.mxu1 %v1733_v21 }
  0xf5   : > { %1556 = vmatprep.subr.bf16.mxu1 %v1912_v15 }
  0xf7   : > { %1533 = vmatpush3.bf16.msra.mxu0 %v1720_v6  ;;  %v808_v19 = vpop.permute.xlu1 %807 }
  0xf8   : > { %1534 = vmatprep.subr.bf16.mxu0 %v1721_v8  ;;  %1557 = vmatpush3.bf16.msra.mxu1 %v1735_v23 }
  0xf9   : > { %1558 = vmatprep.subr.bf16.mxu1 %v1912_v15 }
  0xfb   : > { %1535 = vmatpush3.bf16.msra.mxu0 %v1721_v8 }
  0xfc   : > { %1536 = vmatprep.subr.bf16.mxu0 %v1722_v9  ;;  %1559 = vmatpush3.bf16.msra.mxu1 %v1737_v25 }
  0xfd   : > { %1560 = vmatprep.subr.bf16.mxu1 %v1912_v15 }
  0xff   : > { %1537 = vmatpush3.bf16.msra.mxu0 %v1722_v9 }
 0x100   : > { %1538 = vmatprep.subr.bf16.mxu0 %v1723_v10  ;;  %1561 = vmatpush3.bf16.msra.mxu1 %v1739_v27 }
 0x101   : > { %1562 = vmatprep.subr.bf16.mxu1 %v1912_v15 }
 0x103   : > { %1539 = vmatpush3.bf16.msra.mxu0 %v1723_v10 }
 0x104   : > { %1540 = vmatprep.subr.bf16.mxu0 %v1724_v11  ;;  %1563 = vmatpush3.bf16.msra.mxu1 %v1741_v29 }
 0x105   : > { %1564 = vmatprep.subr.bf16.mxu1 %v1912_v15 }
 0x107   : > { %1541 = vmatpush3.bf16.msra.mxu0 %v1724_v11 }
 0x108   : > { %1542 = vmatprep.subr.bf16.mxu0 %v1725_v12  ;;  %1565 = vmatpush3.bf16.msra.mxu1 %v1743_v30 }
 0x109   : > { %1590 = vmatprep.subr.bf16.mxu1 %v1912_v15 }
 0x10b   : > { %1543 = vmatpush3.bf16.msra.mxu0 %v1725_v12 }
 0x10c   : > { %1544 = vmatprep.subr.bf16.mxu0 %v1726_v13 }
 0x10f   : > { %1545 = vmatpush3.bf16.msra.mxu0 %v1726_v13 }
 0x110   : > { %1570 = vmatprep.subr.bf16.mxu0 %v1912_v15 }
 0x112   : > { %1547 = vmatmul.mubr.bf16.vlgmr.msra.gmra.mrb[4].mxu0 %v651_v3 }
 0x113   : > { %1571 = vmatpush3.bf16.msra.mxu0 %v1727_v14  ;;  %1586 = vmatprep.mubr.msk.bf16.mxu0 %vm1913_vm2, %v1912_v15 }
 0x114   : > { %1572 = vmatprep.subr.bf16.mxu0 %v1912_v15 }
 0x117   : > { %1573 = vmatpush3.bf16.msra.mxu0 %v1728_v16 }
 0x118   : > { %1574 = vmatprep.subr.bf16.mxu0 %v1912_v15 }
 0x11b   : > { %1575 = vmatpush3.bf16.msra.mxu0 %v1730_v18 }
 0x11c   : > { %1576 = vmatprep.subr.bf16.mxu0 %v1912_v15 }
 0x11f   : > { %1577 = vmatpush3.bf16.msra.mxu0 %v1732_v20 }
 0x120   : > { %1578 = vmatprep.subr.bf16.mxu0 %v1912_v15 }
 0x123   : > { %1579 = vmatpush3.bf16.msra.mxu0 %v1734_v22 }
 0x124   : > { %1580 = vmatprep.subr.bf16.mxu0 %v1912_v15 }
 0x127   : > { %1581 = vmatpush3.bf16.msra.mxu0 %v1736_v24 }
 0x128   : > { %1582 = vmatprep.subr.bf16.mxu0 %v1912_v15 }
 0x12b   : > { %1583 = vmatpush3.bf16.msra.mxu0 %v1738_v26 }
 0x12c   : > { %1584 = vmatprep.subr.bf16.mxu0 %v1912_v15 }
 0x12f   : > { %1585 = vmatpush3.bf16.msra.mxu0 %v1740_v28 }
 0x1be   : > { %v1528_v31 = vpop.f32.mrb[0].mxu1 }
 0x1bf   : > { %v615_v32 = vpop.f32.mrb[1].mxu1 }
 0x1c0   : > { %v1529_v33 = vpop.f32.mrb[2].mxu1 }
 0x1c1   : > { %v618_v34 = vpop.f32.mrb[3].mxu1 }
 0x1c5   : > { %v1508_v35 = vpop.f32.mrb[0].mxu0 }
 0x1c6   : > { %v624_v36 = vadd.f32 %v1528_v31, %v1508_v35  ;;  %v514_v37 = vpop.f32.mrb[1].mxu0 }
 0x1c7   : > { %v616_v38 = vadd.f32 %v615_v32, %v514_v37  ;;  %v1509_v39 = vpop.f32.mrb[2].mxu0  ;;  %v1746_v37 = vld [vmem:[#allocation7 + $0x80] sm:$0xff]  }
 0x1c8   : > { %v517_v40 = vpop.f32.mrb[3].mxu0  ;;  %v1747_v39 = vld [vmem:[#allocation7 + $0x88] sm:$0xff]  }
 0x1c9   : > { %v619_v41 = vadd.f32 %v618_v34, %v517_v40  ;;  %v1748_v40 = vld [vmem:[#allocation7 + $0x90] sm:$0xff]  }
 0x1e5   : > { %v1548_v42 = vpop.f32.mrb[4].mxu0 }
 0x1e6   : > { %v753_v44 = vadd.f32 %v1548_v42, %v624_v36  ;;  %v737_v45 = vpop.f32.mrb[5].mxu0  ;;  %v1750_v42 = vld [vmem:[#allocation7 + $0xa0] sm:$0xff]  }
 0x1e7   : > { %v751_v46 = vadd.f32 %v737_v45, %v616_v38  ;;  %v1549_v47 = vpop.f32.mrb[6].mxu0  ;;  %v1752_v45 = vld [vmem:[#allocation7 + $0xb0] sm:$0xff]  }
 0x1e8   : > { %v763_v48 = vadd.f32 %v1383_v43, %v753_v44  ;;  %v740_v49 = vpop.f32.mrb[7].mxu0  ;;  %v1753_v47 = vld [vmem:[#allocation7 + $0xb8] sm:$0xff]  }
 0x1e9   : > { %v761_v50 = vadd.f32 %v1383_v43, %v751_v46  ;;  %v752_v51 = vadd.f32 %v740_v49, %v619_v41  ;;  %v1749_v41 = vld [vmem:[#allocation7 + $0x98] sm:$0xff]  }
 0x1ea   : > { %v766_v52 = vmul.f32 %v763_v48, %v763_v48 }
 0x1eb   : > { %v764_v53 = vmul.f32 %v761_v50, %v761_v50  ;;  %v762_v54 = vadd.f32 %v1383_v43, %v752_v51  ;;  %v1751_v43 = vld [vmem:[#allocation7 + $0xa8] sm:$0xff]  }
 0x1ec   : > { %v769_v55 = vmul.f32 %v766_v52, %v763_v48 }
 0x1ed   : > { %v767_v56 = vmul.f32 %v764_v53, %v761_v50  ;;  %v765_v57 = vmul.f32 %v762_v54, %v762_v54 }
 0x1ee   : > { %v772_v58 = vmul.f32 0.044715, %v769_v55 }
 0x1ef   : > { %v770_v59 = vmul.f32 0.044715, %v767_v56  ;;  %v768_v60 = vmul.f32 %v765_v57, %v762_v54 }
 0x1f0   : > { %v775_v61 = vadd.f32 %v772_v58, %v763_v48 }
 0x1f1   : > { %v773_v62 = vadd.f32 %v770_v59, %v761_v50  ;;  %v771_v63 = vmul.f32 0.044715, %v768_v60 }
 0x1f2   : > { %v778_v0 = vmul.f32 0.7978846, %v775_v61  ;;  %v1418_v61 = vld [vmem:[%s2208_s5] ss:$0 sm:$0xff] }
 0x1f3   : > { %v774_v1 = vadd.f32 %v771_v63, %v762_v54  ;;  %v776_v2 = vmul.f32 0.7978846, %v773_v62 }
 0x1f4   : > { %1755 = vtanh.f32 %v778_v0 }
 0x1f5   : > { %v777_v3 = vmul.f32 0.7978846, %v774_v1  ;;  %1757 = vtanh.f32 %v776_v2 }
 0x1f7   : > { %1759 = vtanh.f32 %v777_v3 }
 0x1fe   : > { %v1756_v4 = vpop.eup %1755 }
 0x1ff   : > { %v1758_v5 = vpop.eup %1757  ;;  %v784_v6 = vadd.f32 1.0, %v1756_v4  ;;  %v1199_v4 = vpop.permute.xlu0 %1198 }
 0x200   : > { %v782_v8 = vadd.f32 1.0, %v1758_v5 }
 0x201   : > { %v1760_v9 = vpop.eup %1759  ;;  %v787_v10 = vmul.f32 0.5, %v784_v6 }
 0x202   : > { %v783_v11 = vadd.f32 1.0, %v1760_v9  ;;  %v785_v12 = vmul.f32 0.5, %v782_v8 }
 0x203   : > { %v790_v13 = vmul.f32 %v787_v10, %v763_v48 }
 0x204   : > { %v786_v14 = vmul.f32 0.5, %v783_v11  ;;  %v788_v17 = vmul.f32 %v785_v12, %v761_v50 }
 0x205   : > { %v799_v16 = vpack.c.bf16 %v790_v13, %v790_v13 }
 0x206   : > { %v789_v18 = vmul.f32 %v786_v14, %v762_v54 }
 0x207   : > { %v811_v20 = vmul.bf16 %v808_v19, %v799_v16 }
 0x208   : > { %v798_v21 = vpack.c.bf16 %v789_v18, %v788_v17 }
 0x209   : > { %v1389_v22 = vcombine.low %v811_v20, %v811_v20 }
 0x20a   : > { %v810_v23 = vmul.bf16 %v803_v7, %v798_v21  ;;  %v1204_v7 = vpop.permute.xlu1 %1203 }
 0x20b   : > { %825 = vst [vmem:[#allocation3 + $0x8] sm:$0x1] %v1389_v22 }
 0x20c   : > { %v1387_v24 = vcombine.low %v810_v23, %v810_v23  ;;  %v1388_v25 = vcombine.high %v810_v23, %v810_v23 }
 0x20e   : > { %823 = vst [vmem:[#allocation3] sm:$0xf] %v1387_v24  ;;  %824 = vst [vmem:[#allocation3 + $0x4] sm:$0xf] %v1388_v25 }
 0x212   : > { %v1745_v26 = vld [vmem:[#allocation3 + $0x8] ss:$0 sps:$4 sm:$0x11]  }
 0x213   : > { %v879_v32 = vshll.u32 %v1745_v26, 16  ;;  %v1089_v49 = vrot.slane %v1745_v26, 1 }
 0x215   : > { %v1742_v27 = vld [vmem:[#allocation3] sm:$0xff]   ;;  %v881_v36 = vrot.slane %v879_v32, 1 }
 0x216   : > { %v844_v28 = vld [vmem:[#allocation3] sm:$0xf]  ;;  %v845_v29 = vld [vmem:[#allocation3 + $0x4] sm:$0xf]  ;;  %1587 = vmatmul.mubr.bf16.vlgmr.msra.gmra.mrb[8].mxu0 %v1742_v27 }
 0x217   : > { %v1390_v30 = vcombine.low %v844_v28, %v845_v29  ;;  %v1068_v44 = vld [vmem:[#allocation3] sm:$0xe] }
 0x218   : > { %v1409_v46 = vcombine.low %v1068_v44, %v845_v29 }
 0x219   : > { %v874_v31 = vshll.u32 %v1390_v30, 16  ;;  %v872_v33 = vshrl.u32 %v1390_v30, 16 }
 0x21a   : > { %v1088_v48 = vrot.slane %v1409_v46, 1 }
 0x21b   : > { %v876_v34 = vrot.slane %v874_v31, 1 }
 0x21c   : > { %v1090_v50 = vsel %vm649_vm1, %v1088_v48, %v1089_v49 }
 0x21d   : > { %v877_v35 = vor.u32 %v876_v34, %v872_v33 }
 0x21f   : > { %v882_v38 = vsel %vm414_vm0, %v877_v35, %v881_v36 }
 0x220   : > { %1567 = vmatmul.mubr.bf16.vlgmr.msra.gmra.mrb[4].mxu1 %v882_v38 }
 0x221   : > { %1591 = vmatpush3.bf16.msra.mxu1 %v1746_v37  ;;  %1606 = vmatprep.mubr.msk.bf16.mxu1 %vm1913_vm2, %v1912_v15 }
 0x222   : > { %1592 = vmatprep.subr.bf16.mxu1 %v1912_v15 }
 0x225   : > { %1593 = vmatpush3.bf16.msra.mxu1 %v1747_v39 }
 0x226   : > { %1594 = vmatprep.subr.bf16.mxu1 %v1912_v15 }
 0x229   : > { %1595 = vmatpush3.bf16.msra.mxu1 %v1748_v40 }
 0x22a   : > { %1596 = vmatprep.subr.bf16.mxu1 %v1912_v15 }
 0x22d   : > { %1597 = vmatpush3.bf16.msra.mxu1 %v1749_v41 }
 0x22e   : > { %1598 = vmatprep.subr.bf16.mxu1 %v1912_v15 }
 0x231   : > { %1599 = vmatpush3.bf16.msra.mxu1 %v1750_v42 }
 0x232   : > { %1600 = vmatprep.subr.bf16.mxu1 %v1912_v15 }
 0x235   : > { %1601 = vmatpush3.bf16.msra.mxu1 %v1751_v43 }
 0x236   : > { %1602 = vmatprep.subr.bf16.mxu1 %v1912_v15 }
 0x239   : > { %1603 = vmatpush3.bf16.msra.mxu1 %v1752_v45 }
 0x23a   : > { %1604 = vmatprep.subr.bf16.mxu1 %v1912_v15 }
 0x23d   : > { %1605 = vmatpush3.bf16.msra.mxu1 %v1753_v47 }
 0x240   : > { %1607 = vmatmul.mubr.bf16.vlgmr.msra.gmra.mrb[8].mxu1 %v1090_v50 }
 0x2e9   : > { %v1061_v51 = vpop.f32.mrb[8].mxu0 }
 0x2ea   : > { %v1588_v52 = vpop.f32.mrb[9].mxu0 }
 0x2eb   : > { %v1064_v53 = vpop.f32.mrb[10].mxu0 }
 0x2ec   : > { %v1589_v54 = vpop.f32.mrb[11].mxu0 }
 0x2f3   : > { %v966_v55 = vpop.f32.mrb[4].mxu1 }
 0x2f4   : > { %v1062_v56 = vadd.f32 %v1061_v51, %v966_v55  ;;  %v1568_v57 = vpop.f32.mrb[5].mxu1 }
 0x2f5   : > { %v969_v58 = vpop.f32.mrb[6].mxu1 }
 0x2f6   : > { %v1065_v59 = vadd.f32 %v1064_v53, %v969_v58  ;;  %v1569_v60 = vpop.f32.mrb[7].mxu1 }
 0x313   : > { %v1174_v15 = vpop.f32.mrb[8].mxu1 }
 0x314   : > { %v1181_v62 = vadd.f32 %v1174_v15, %v1062_v56  ;;  %v1608_v63 = vpop.f32.mrb[9].mxu1 }
 0x315   : > { %v1177_v0 = vpop.f32.mrb[10].mxu1 }
 0x316   : > { %v1190_v1 = vadd.f32 %v1418_v61, %v1181_v62  ;;  %v1182_v2 = vadd.f32 %v1177_v0, %v1065_v59  ;;  %v1609_v3 = vpop.f32.mrb[11].mxu1 }
 0x318   : > { %v1206_v5 = vmul.f32 %v1199_v4, %v1190_v1  ;;  %v1191_v6 = vadd.f32 %v1418_v61, %v1182_v2 }
 0x31a   : > { %1208 = vst [vmem:[%s303_s29] sm:$0xff] %v1206_v5  ;;  %v1207_v8 = vmul.f32 %v1204_v7, %v1191_v6 }
 0x31c   : > { %1209 = vst [vmem:[%s303_s29 + $0x8] sm:$0xff] %v1207_v8 }
 0x31d   : > { %1830 = shalt.err (!%p1827_p6)
}
 0x31e   : > { %s1831_s28 = scalar_lea.hbm %s2155_s18, 256  ;;  %s1835_s13 = scalar_lea.hbm %s2209_s6, 512 }
 0x31f   : > { %p1832_p7 = scmp.ne.s32.totalorder %s2155_s18, %s1831_s28  ;;  %p1836_p0 = scmp.lt.u32.totalorder %s2155_s18, %s2209_s6 }
 0x320   : > { %p1837_p4 = scmp.lt.u32.totalorder %s1835_s13, %s1831_s28  ;;  %p1839_p13 = scmp.lt.u32.totalorder %s1831_s28, %s2155_s18 }
 0x321   : > { %p1833_p9 = pnand %p1832_p7, %p2225_p8 }
 0x322   : > { %p1838_p1 = por %p1837_p4, %p1836_p0 }
 0x323   : > { %p1834_p12 = pneg %p1833_p9 }
 0x324   : > { %p1840_p10 = por %p1839_p13, %p1838_p1 }
 0x326   : > { %p1841_p11 = pnand %p1840_p10, %p1834_p12 }
 0x328   : > { %1844 = shalt.err (!%p1841_p11)
}
 0x329   : > { %s1915_s29 = smov 128   ;;  %s1916_s15 = smov 8  }
 0x32a   : > { %1620 = dma.vmem_to_hbm [thread:$0]  (%p2225_p8), %s2150_s11, 256, %s2155_s18, %s2157_s12, %s1915_s29, %s1915_s29, %s1916_s15  }
 0x32b PF: > { %p1637_p2 = scmp.ge.s32.totalorder %s1903_s26, 2  ;;  %s1241_s17 = sand.u32 1, %s1883_s21  }
 0x32c   : > { %p2226_p3 = scmp.ne.s32.totalorder %s2219_s9, 0  ;;  %s1242_s16 = scalar_lea.sflag [#allocation6], %s1241_s17 }
 0x32e   : > { %p1630_p5 = pnand %p1637_p2, %p2226_p3 }
 0x330   : > { %1878 = dma.done.wait (!%p1630_p5), %s1242_s16, 256  }
 0x331   : > { %1880 = vsyncadd (!%p1630_p5), %s1242_s16, 4294967040  ;;  %s21_s26 = sadd.s32 1, %s1903_s26   ;;  %s2227_s24 = sld [smem:[#allocation13_spill]] }
 0x332   : > { %p18_p6 = scmp.ge.s32.totalorder %s21_s26, 4   ;;  %s2228_s25 = sld [smem:[#allocation14_spill]] }
 0x333   : > { %s2229_s21 = smov %s1887_s22  ;;  %s2230_s22 = smov %s1891_s23 }
 0x334   : > { %s2231_s23 = smov %s2005_s10  ;;  %20 = sbr.rel (!%p18_p6) target bundleno = 6 (0x6), region = 95 }
 0x33b   :  { %1247 = vsyncpa [#allocation5], 1 }
 0x33c   :  { %1249 = vsyncpa [#allocation5 + $0x1], 1 }
 0x33d   :  { %1250 = vsyncpa [#allocation8], 1 }
 0x33e   :  { %1251 = vsyncpa [#allocation6], 1 }
 0x33f   :  { %1253 = vsyncpa [#allocation6 + $0x1], 1 }

// kernel: tpu_custom_call.1
= control target key start
LH: loop header
LB: loop body
LE: loop exit
PB: predicated region body
PF: predicated region fallthrough
CT: control target
= control target key end

     0   :  { %11 = vsyncpa [#allocation5], 0  ;;  %s2203_s0 = inlined_call_operand.vmem [shape: bf16[2,24,128], index: 0, kind: input, shape index: {}]   ;;  %s2204_s1 = inlined_call_operand.vmem [shape: f32[2,24,1], index: 1, kind: input, shape index: {}]   ;;  %s2205_s2 = inlined_call_operand.hbm [shape: bf16[384,128], index: 2, kind: input, shape index: {}]   ;;  %s2206_s3 = inlined_call_operand.vmem [shape: f32[1,128], index: 3, kind: input, shape index: {}]   ;;  %s2207_s4 = inlined_call_operand.hbm [shape: bf16[384,128], index: 4, kind: input, shape index: {}]   ;;  %s2208_s5 = inlined_call_operand.vmem [shape: f32[1,128], index: 5, kind: input, shape index: {}]   ;;  %s2209_s6 = inlined_call_operand.hbm [shape: f32[2,16,128], index: 6, kind: output, shape index: {}]  }
   0x1   :  { %12 = vsyncpa [#allocation8], 0 }
   0x2   :  { %13 = vsyncpa [#allocation6], 0 }
   0x3   :  { %15 = vsyncpa [#allocation6 + $0x1], 0  ;;  %s1952_s21 = smov 0   ;;  %s1954_s22 = smov 0  }
   0x4   :  { %s1956_s23 = smov 0   ;;  %s1958_s24 = smov 0  }
   0x5   :  { %s1960_s25 = smov 0   ;;  %s1962_s26 = smov 0  }
   0x6 LB: > { %2216 = sst [smem:[#allocation13_spill]] %s1899_s25  ;;  %s1343_s27 = sadd.s32 4294967295, %s1903_s26   ;;  %s1903_s26 = sphi %s1962_s26, %s21_s26   ;;  %s1899_s25 = sphi %s1960_s25, %s2228_s25   ;;  %s1895_s24 = sphi %s1958_s24, %s2227_s24   ;;  %s1891_s23 = sphi %s1956_s23, %s2231_s23   ;;  %s1887_s22 = sphi %s1954_s22, %s2230_s22   ;;  %s1883_s21 = sphi %s1952_s21, %s2229_s21  }
   0x7   : > { %s1344_s28 = sadd.s32 4294967294, %s1903_s26   ;;  %s33_s29 = sadd.s32 1, %s1899_s25 }
   0x8   : > { %s178_s30 = sadd.s32 1, %s1891_s23  ;;  %p35_p0 = scmp.ge.s32.totalorder %s33_s29, 2 }
   0x9   : > { %p188_p1 = scmp.ne.s32.totalorder %s1891_s23, %s1887_s22  ;;  %p189_p2 = scmp.eq.s32.totalorder %s1343_s27, 1 }
   0xa   : > { %p194_p3 = scmp.ne.s32.totalorder %s1887_s22, %s1883_s21  ;;  %s2233_s29 = smov (%p35_p0, %s33_s29), 0 }
   0xb   : > { %2217 = sst [smem:[#allocation14_spill]] %s2233_s29  ;;  %p1992_p4 = por %p189_p2, %p188_p1 }
   0xc   : > { %p195_p5 = scmp.eq.s32.totalorder %s1344_s28, 1  ;;  %s173_s8 = ssub.s32 %s1899_s25, %s2233_s29 }
   0xd   : > { %s2218_s7 = scalar_select %p1992_p4, 1, 0 }
   0xe   : > { %p1345_p6 = scmp.ge.s32.totalorder %s1903_s26, 1  ;;  %p176_p7 = scmp.eq.s32.totalorder %s173_s8, 0 }
   0xf   : > { %p1999_p8 = por %p195_p5, %p194_p3  ;;  %p202_p9 = scmp.lt.s32.totalorder %s1903_s26, 3 }
  0x10   : > { %s2005_s10 = scalar_select %p176_p7, %s1891_s23, %s178_s30  }
  0x11   : > { %s2219_s9 = scalar_select %p1999_p8, 1, 0 }
  0x12   : > { %p2007_p10 = pnand %p1345_p6, %p202_p9  ;;  %p2011_p11 = scmp.eq.s32.totalorder %s1343_s27, 0 }
  0x13   : > { %s1905_s13 = smov [#allocation4]   ;;  %s1906_s16 = smov [#allocation7]  }
  0x14   : > { %s2220_s11 = scalar_select %p2007_p10, 1, 0 }
  0x15   : > { %s2221_s12 = scalar_select %p2011_p11, 1, 0 }
  0x16   : > { %p1622_p12 = pneg %p2007_p10  ;;  %s214_s14 = sshll.u32 %s1905_s13, 4  ;;  %s215_s14 = int_to_ptr.vmem [resolvable:$true] %s214_s14 }
  0x17   : > { %s230_s17 = sshll.u32 %s1906_s16, 4  ;;  %s1761_s20 = scalar_lea.hbm %s2205_s2, 3072  ;;  %s2023_s17 = int_to_ptr.vmem [resolvable:$true] %s230_s17 }
  0x18   : > { %p2019_p13 = pnand %p2011_p11, %p1622_p12  ;;  %p1762_p0 = scmp.ne.s32.totalorder %s2205_s2, %s1761_s20 }
  0x19   : > { %p1768_p5 = scmp.lt.u32.totalorder %s1761_s20, %s2205_s2 }
  0x1a   : > { %p1763_p1 = pneg %p2019_p13 }
  0x1c   : > { %p1764_p2 = pnand %p1763_p1, %p1762_p0 }
  0x1e   : > { %p1765_p3 = pneg %p1764_p2 }
  0x20   : > { %p1770_p6 = pnand %p1768_p5, %p1765_p3 }
  0x22   : > { %1773 = shalt.err (!%p1770_p6)
}
  0x23   : > { %s1774_s13 = scalar_lea.vmem %s215_s14, 3072  ;;  %p1782_p8 = scmp.lt.s32.totalorder %s215_s14, %s215_s14 }
  0x24   : > { %p1775_p7 = scmp.ne.s32.totalorder %s215_s14, %s1774_s13  ;;  %p1783_p4 = scmp.lt.s32.totalorder %s1774_s13, %s1774_s13 }
  0x26   : > { %p1777_p9 = pnand %p1775_p7, %p1763_p1  ;;  %p1784_p11 = por %p1783_p4, %p1782_p8 }
  0x28   : > { %p1778_p12 = pneg %p1777_p9 }
  0x2a   : > { %p1785_p10 = pnand %p1784_p11, %p1778_p12 }
  0x2c   : > { %1788 = shalt.err (!%p1785_p10)
}
  0x2d   : > { %s1907_s16 = smov 64   ;;  %s1908_s18 = smov 4  }
  0x2e   : > { %1625 = dma.hbm_to_vmem [thread:$0]  (!%p2019_p13), %s2205_s2, 3072, %s215_s14, [#allocation5], %s1907_s16, %s1907_s16, %s1908_s18  }
  0x2f   : > { %s1789_s30 = scalar_lea.hbm %s2207_s4, 3072 }
  0x30   : > { %p1790_p0 = scmp.ne.s32.totalorder %s2207_s4, %s1789_s30  ;;  %p1796_p10 = scmp.lt.u32.totalorder %s1789_s30, %s2207_s4 }
  0x32   : > { %p1792_p4 = pnand %p1790_p0, %p1763_p1 }
  0x34   : > { %p1793_p8 = pneg %p1792_p4 }
  0x36   : > { %p1798_p11 = pnand %p1796_p10, %p1793_p8 }
  0x38   : > { %1801 = shalt.err (!%p1798_p11)
}
  0x39   : > { %s1802_s14 = scalar_lea.vmem %s2023_s17, 3072  ;;  %p1810_p6 = scmp.lt.s32.totalorder %s2023_s17, %s2023_s17 }
  0x3a   : > { %p1803_p2 = scmp.ne.s32.totalorder %s2023_s17, %s1802_s14  ;;  %p1811_p7 = scmp.lt.s32.totalorder %s1802_s14, %s1802_s14 }
  0x3c   : > { %p1805_p3 = pnand %p1803_p2, %p1763_p1  ;;  %p1812_p9 = por %p1811_p7, %p1810_p6 }
  0x3e   : > { %p1806_p5 = pneg %p1805_p3 }
  0x40   : > { %p1813_p12 = pnand %p1812_p9, %p1806_p5 }
  0x42   : > { %1816 = shalt.err (!%p1813_p12)
}
  0x43   : > { %1628 = dma.hbm_to_vmem [thread:$0]  (!%p2019_p13), %s2207_s4, 3072, %s2023_s17, [#allocation8], %s1907_s16, %s1907_s16, %s1908_s18  }
  0x44   : > { %p2223_p0 = scmp.ne.s32.totalorder %s2220_s11, 0 }
  0x45   : > { %p2224_p4 = scmp.ne.s32.totalorder (!%p2223_p0), %s2221_s12, 0 }
  0x46   : > { %265 = sbr.rel (%p2223_p0) target bundleno = 811 (0x32b), region = 44 }
  0x4d   : > { %1870 = dma.done.wait (%p2224_p4), [#allocation5], 3072  }
  0x4e   : > { %1872 = vsyncadd (%p2224_p4), [#allocation5], 4294964224 }
  0x4f   : > { %1874 = dma.done.wait (%p2224_p4), [#allocation8], 3072  }
  0x50   : > { %1876 = vsyncadd (%p2224_p4), [#allocation8], 4294964224  ;;  %p304_p1 = scmp.lt.s32.totalorder %s1895_s24, 1  ;;  %v1909_v0 = vmov 0   ;;  %v1699_v5 = vld [vmem:[#allocation4] sm:$0xff]   ;;  %v1700_v7 = vld [vmem:[#allocation4 + $0x8] sm:$0xff]   ;;  %v343_v32 = vlaneseq }
  0x51   : > { %1697 = vset.pattern.permute.xlu0 %v1909_v0  ;;  %1698 = vset.pattern.permute.xlu1 %v1909_v0  ;;  %v1701_v8 = vld [vmem:[#allocation4 + $0x40] sm:$0xff]   ;;  %v1702_v9 = vld [vmem:[#allocation4 + $0x10] sm:$0xff]   ;;  %v1703_v10 = vld [vmem:[#allocation4 + $0x48] sm:$0xff]   ;;  %v1910_v30 = vmov 839922192   ;;  %vm649_vm1 = vcmask 1046528  }
  0x52   : > { %s2084_s11 = scalar_select %p304_p1, %s1895_s24, 1  ;;  %1510 = vmatprep.subr.bf16.mxu1 %v1699_v5  ;;  %1490 = vmatprep.subr.bf16.mxu0 %v1701_v8  ;;  %v1705_v12 = vld [vmem:[#allocation4 + $0x50] sm:$0xff]   ;;  %v1704_v13 = vld [vmem:[#allocation4 + $0x18] sm:$0xff]   ;;  %v1706_v15 = vld [vmem:[#allocation4 + $0x20] sm:$0xff]   ;;  %v341_v31 = vunpack.c.l.s4 %v1910_v30  ;;  %v1911_v33 = vmov 1985246804  }
  0x53   : > { %1511 = vmatpush3.bf16.msra.mxu1 %v1699_v5  ;;  %1491 = vmatpush3.bf16.msra.mxu0 %v1701_v8  ;;  %v1707_v14 = vld [vmem:[#allocation4 + $0x58] sm:$0xff]   ;;  %v1709_v16 = vld [vmem:[#allocation4 + $0x60] sm:$0xff]   ;;  %v1708_v17 = vld [vmem:[#allocation4 + $0x28] sm:$0xff]   ;;  %v348_v34 = vunpack.c.l.s4 %v1911_v33  ;;  %v344_v36 = vshrl.u32 %v343_v32, 7  ;;  %vm414_vm0 = vsmask.f32 7424 }
  0x54   : > { %s1611_s15 = smul.u32 24, %s2084_s11  ;;  %1512 = vmatprep.subr.bf16.mxu1 %v1700_v7  ;;  %1492 = vmatprep.subr.bf16.mxu0 %v1703_v10  ;;  %v1710_v18 = vld [vmem:[#allocation4 + $0x30] sm:$0xff]   ;;  %v1711_v19 = vld [vmem:[#allocation4 + $0x68] sm:$0xff]   ;;  %v1712_v21 = vld [vmem:[#allocation4 + $0x38] sm:$0xff]   ;;  %v342_v35 = vunpack.c.0.s8 %v341_v31  ;;  %vm1913_vm2 = vmmov 0   ;;  %s301_s8 = sand.u32 1, %s1887_s22  }
  0x55   : > { %v1713_v20 = vld [vmem:[#allocation4 + $0x70] sm:$0xff]   ;;  %v1717_v22 = vld [vmem:[#allocation4 + $0x78] sm:$0xff]   ;;  %v2096_v23 = vld [vmem:[#allocation4 + $0x80] sm:$0xff]   ;;  %s1610_s12 = smul.u32 12, %s2084_s11  ;;  %v349_v37 = vunpack.c.0.s8 %v348_v34  ;;  %s1352_s13 = sshll.u32 %s301_s8, 4 }
  0x56   : > { %s2090_s18 = scalar_lea.vmem %s2204_s1, %s1611_s15  ;;  %v345_v38 = vsub.s32 %v342_v35, %v344_v36  ;;  %v1721_v8 = vld [vmem:[#allocation4 + $0x90] sm:$0xff]   ;;  %v1743_v30 = vld [vmem:[#allocation7 + $0x78] sm:$0xff]   ;;  %s303_s29 = scalar_lea.vmem [#allocation9], %s1352_s13 }
  0x57   : > { %v318_v1 = vld [vmem:[%s2090_s18] sm:$0xff]  ;;  %v319_v2 = vld [vmem:[%s2090_s18 + $0x8] sm:$0xff]  ;;  %v320_v3 = vld [vmem:[%s2090_s18 + $0x10] sm:$0xf]  ;;  %1513 = vmatpush3.bf16.msra.mxu1 %v1700_v7  ;;  %1493 = vmatpush3.bf16.msra.mxu0 %v1703_v10  ;;  %s308_s27 = scalar_lea.vmem %s2203_s0, %s1610_s12  ;;  %v352_v39 = vsub.s32 %v349_v37, %v344_v36  ;;  %s1226_s11 = sshll.u32 %s303_s29, 4  ;;  %s2150_s11 = int_to_ptr.vmem [resolvable:$true] %s1226_s11 }
  0x58   : > { %v321_v4 = vpack.c.bf16 %v319_v2, %v318_v1  ;;  %v322_v6 = vpack.c.bf16 %v320_v3, %v320_v3  ;;  %v1419_v11 = vld [vmem:[%s2090_s18 + $0x2] sm:$0xff]  ;;  %1514 = vmatprep.subr.bf16.mxu1 %v1702_v9  ;;  %1494 = vmatprep.subr.bf16.mxu0 %v1705_v12  ;;  %v1386_v26 = vld [vmem:[%s2090_s18 + $0x11] sm:$0x3]  ;;  %v1723_v10 = vld [vmem:[#allocation4 + $0xa0] sm:$0xff]   ;;  %s1426_s15 = sshll.u32 %s1895_s24, 8  ;;  %s2157_s12 = scalar_lea.sflag [#allocation6], %s301_s8 }
  0x59   : > { %v1384_v24 = vld [vmem:[%s2090_s18 + $0x1] sm:$0xff]  ;;  %v1385_v25 = vld [vmem:[%s2090_s18 + $0x9] sm:$0xff]  ;;  %v797_v28 = vpack.c.bf16 %v1386_v26, %v1386_v26  ;;  %s1817_s24 = scalar_lea.vmem %s2150_s11, 256  ;;  %p2225_p8 = scmp.ne.s32.totalorder %s2218_s7, 0 }
  0x5a   : > { %332 = vperm.xlu0 %1697, %v321_v4   ;;  %v796_v27 = vpack.c.bf16 %v1385_v25, %v1384_v24  ;;  %v1420_v29 = vld [vmem:[%s2090_s18 + $0xa] sm:$0xff]  ;;  %v327_v40 = vld [vmem:[%s308_s27] sm:$0xf]  ;;  %v328_v41 = vld [vmem:[%s308_s27 + $0x4] sm:$0xf]  ;;  %s2155_s18 = scalar_lea.hbm %s2209_s6, %s1426_s15  ;;  %p1818_p13 = scmp.ne.s32.totalorder %s2150_s11, %s1817_s24 }
  0x5b   : > { %1515 = vmatpush3.bf16.msra.mxu1 %v1702_v9  ;;  %1495 = vmatpush3.bf16.msra.mxu0 %v1705_v12  ;;  %v329_v47 = vld [vmem:[%s308_s27 + $0x8] sm:$0x3]  ;;  %v1722_v9 = vld [vmem:[#allocation4 + $0x98] sm:$0xff]   ;;  %v1736_v24 = vld [vmem:[#allocation7 + $0x28] sm:$0xff]   ;;  %s1914_s19 = smov [#allocation9]  }
  0x5c   : > { %1516 = vmatprep.subr.bf16.mxu1 %v1704_v13  ;;  %1496 = vmatprep.subr.bf16.mxu0 %v1707_v14  ;;  %v1725_v12 = vld [vmem:[#allocation4 + $0xb0] sm:$0xff]   ;;  %v1737_v25 = vld [vmem:[#allocation7 + $0x60] sm:$0xff]   ;;  %p1819_p10 = pnand %p1818_p13, %p2225_p8  ;;  %s1821_s20 = sshll.u32 %s1914_s19, 4  ;;  %s1822_s20 = int_to_ptr.vmem [resolvable:$false] %s1821_s20 }
  0x5d   : > { %802 = vperm.xlu1 %1698, %v796_v27   ;;  %v1738_v26 = vld [vmem:[#allocation7 + $0x30] sm:$0xff]   ;;  %v1739_v27 = vld [vmem:[#allocation7 + $0x68] sm:$0xff]   ;;  %s1823_s27 = scalar_lea.vmem %s1822_s20, 512  ;;  %p1824_p2 = scmp.lt.s32.totalorder %s2150_s11, %s1822_s20 }
  0x5e   : > { %336 = vperm.xlu0 %1697, %v322_v6   ;;  %v1720_v6 = vld [vmem:[#allocation4 + $0x88] sm:$0xff]   ;;  %p1820_p11 = pneg %p1819_p10  ;;  %p1825_p3 = scmp.lt.s32.totalorder %s1823_s27, %s1817_s24 }
  0x5f   : > { %1517 = vmatpush3.bf16.msra.mxu1 %v1704_v13  ;;  %1497 = vmatpush3.bf16.msra.mxu0 %v1707_v14  ;;  %v1726_v13 = vld [vmem:[#allocation4 + $0xb8] sm:$0xff]   ;;  %v1727_v14 = vld [vmem:[#allocation7] sm:$0xff]  }
  0x60   : > { %1518 = vmatprep.subr.bf16.mxu1 %v1706_v15  ;;  %1498 = vmatprep.subr.bf16.mxu0 %v1709_v16  ;;  %p1826_p5 = por %p1825_p3, %p1824_p2 }
  0x61   : > { %807 = vperm.xlu1 %1698, %v797_v28   ;;  %v1740_v28 = vld [vmem:[#allocation7 + $0x38] sm:$0xff]  }
  0x62   : > { %1198 = vperm.xlu0 %1697, %v1419_v11   ;;  %v1724_v11 = vld [vmem:[#allocation4 + $0xa8] sm:$0xff]   ;;  %p1827_p6 = pnand %p1826_p5, %p1820_p11 }
  0x63   : > { %1519 = vmatpush3.bf16.msra.mxu1 %v1706_v15  ;;  %1499 = vmatpush3.bf16.msra.mxu0 %v1709_v16  ;;  %v1912_v15 = vmov 0.0   ;;  %v1728_v16 = vld [vmem:[#allocation7 + $0x8] sm:$0xff]  }
  0x64   : > { %1520 = vmatprep.subr.bf16.mxu1 %v1708_v17  ;;  %1500 = vmatprep.subr.bf16.mxu0 %v1711_v19 }
  0x65   : > { %1203 = vperm.xlu1 %1698, %v1420_v29   ;;  %v1741_v29 = vld [vmem:[#allocation7 + $0x70] sm:$0xff]  }
  0x67   : > { %1521 = vmatpush3.bf16.msra.mxu1 %v1708_v17  ;;  %1501 = vmatpush3.bf16.msra.mxu0 %v1711_v19  ;;  %v1729_v17 = vld [vmem:[#allocation7 + $0x40] sm:$0xff]   ;;  %v1731_v19 = vld [vmem:[#allocation7 + $0x48] sm:$0xff]  }
  0x68   : > { %1522 = vmatprep.subr.bf16.mxu1 %v1710_v18  ;;  %1502 = vmatprep.subr.bf16.mxu0 %v1713_v20 }
  0x6b   : > { %1523 = vmatpush3.bf16.msra.mxu1 %v1710_v18  ;;  %1503 = vmatpush3.bf16.msra.mxu0 %v1713_v20  ;;  %v1730_v18 = vld [vmem:[#allocation7 + $0x10] sm:$0xff]   ;;  %v1732_v20 = vld [vmem:[#allocation7 + $0x18] sm:$0xff]  }
  0x6c   : > { %1524 = vmatprep.subr.bf16.mxu1 %v1712_v21  ;;  %1504 = vmatprep.subr.bf16.mxu0 %v1717_v22 }
  0x6f   : > { %1525 = vmatpush3.bf16.msra.mxu1 %v1712_v21  ;;  %1505 = vmatpush3.bf16.msra.mxu0 %v1717_v22  ;;  %v1733_v21 = vld [vmem:[#allocation7 + $0x50] sm:$0xff]   ;;  %v1734_v22 = vld [vmem:[#allocation7 + $0x20] sm:$0xff]  }
  0x70   : > { %1530 = vmatprep.subr.bf16.mxu0 %v2096_v23  ;;  %1550 = vmatprep.subr.bf16.mxu1 %v1912_v15 }
  0xd9   : > { %v333_v42 = vpop.permute.xlu0 %332 }
  0xda   : > { %v346_v43 = vrot.slane %v333_v42, %v345_v38  ;;  %v353_v44 = vrot.slane %v333_v42, %v352_v39 }
  0xdc   : > { %v364_v45 = vmul.bf16 %v346_v43, %v327_v40  ;;  %v365_v46 = vmul.bf16 %v353_v44, %v328_v41  ;;  %v1383_v43 = vld [vmem:[%s2206_s3] ss:$0 sm:$0xff] }
  0xdd   : > { %v337_v48 = vpop.permute.xlu0 %336 }
  0xde   : > { %v1432_v49 = vcombine.low %v364_v45, %v365_v46  ;;  %v360_v50 = vrot.slane %v337_v48, %v345_v38 }
  0xe0   : > { %1431 = vst [vmem:[#allocation2] sm:$0xff] %v1432_v49   ;;  %v366_v51 = vmul.bf16 %v360_v50, %v329_v47 }
  0xe2   : > { %369 = vst [vmem:[#allocation2 + $0x8] sm:$0x3] %v366_v51 }
  0xe7   : > { %v370_v52 = vld [vmem:[#allocation2] sm:$0xf]  ;;  %v371_v53 = vld [vmem:[#allocation2 + $0x4] sm:$0xf] }
  0xe8   : > { %v1355_v54 = vcombine.low %v370_v52, %v371_v53  ;;  %v629_v55 = vld [vmem:[#allocation2] sm:$0xe] }
  0xe9   : > { %v1716_v56 = vld [vmem:[#allocation2 + $0x8] ss:$0 sps:$4 sm:$0x11]   ;;  %v1374_v58 = vcombine.low %v629_v55, %v371_v53 }
  0xea   : > { %1526 = vmatprep.mubr.bf16.mxu1 %v1355_v54  ;;  %v1718_v57 = vld [vmem:[#allocation2 + $0x8] ss:$0 sps:$4 sm:$0x33]   ;;  %v418_v59 = vshll.u32 %v1355_v54, 16  ;;  %v416_v61 = vshrl.u32 %v1355_v54, 16 }
  0xeb   : > { %1527 = vmatmul.mubr.bf16.vlgmr.msra.gmra.mrb[0].mxu1 %v1716_v56  ;;  %v423_v60 = vshll.u32 %v1718_v57, 16  ;;  %v427_v0 = vshrl.u32 %v1718_v57, 16  ;;  %v650_v2 = vrot.slane %v1374_v58, 1  ;;  %v651_v3 = vrot.slane %v1718_v57, 1 }
  0xec   : > { %v420_v62 = vrot.slane %v418_v59, 1  ;;  %1551 = vmatpush3.bf16.msra.mxu1 %v1729_v17  ;;  %1566 = vmatprep.mubr.msk.bf16.mxu1 %vm1913_vm2, %v1912_v15 }
  0xed   : > { %v425_v63 = vrot.slane %v423_v60, 1  ;;  %v652_v7 = vsel %vm649_vm1, %v650_v2, %v651_v3  ;;  %1552 = vmatprep.subr.bf16.mxu1 %v1912_v15 }
  0xee   : > { %v421_v1 = vor.u32 %v420_v62, %v416_v61 }
  0xef   : > { %v429_v4 = vor.u32 %v427_v0, %v425_v63 }
  0xf0   : > { %v426_v5 = vsel %vm414_vm0, %v421_v1, %v425_v63  ;;  %1553 = vmatpush3.bf16.msra.mxu1 %v1731_v19 }
  0xf1   : > { %1506 = vmatprep.mubr.bf16.mxu0 %v426_v5  ;;  %1554 = vmatprep.subr.bf16.mxu1 %v1912_v15 }
  0xf2   : > { %1507 = vmatmul.mubr.bf16.vlgmr.msra.gmra.mrb[0].mxu0 %v429_v4 }
  0xf3   : > { %1531 = vmatpush3.bf16.msra.mxu0 %v2096_v23  ;;  %1546 = vmatprep.mubr.bf16.mxu0 %v652_v7  ;;  %v1735_v23 = vld [vmem:[#allocation7 + $0x58] sm:$0xff]   ;;  %v803_v7 = vpop.permute.xlu1 %802 }
  0xf4   : > { %1532 = vmatprep.subr.bf16.mxu0 %v1720_v6  ;;  %1555 = vmatpush3.bf16.msra.mxu1 %v1733_v21 }
  0xf5   : > { %1556 = vmatprep.subr.bf16.mxu1 %v1912_v15 }
  0xf7   : > { %1533 = vmatpush3.bf16.msra.mxu0 %v1720_v6  ;;  %v808_v19 = vpop.permute.xlu1 %807 }
  0xf8   : > { %1534 = vmatprep.subr.bf16.mxu0 %v1721_v8  ;;  %1557 = vmatpush3.bf16.msra.mxu1 %v1735_v23 }
  0xf9   : > { %1558 = vmatprep.subr.bf16.mxu1 %v1912_v15 }
  0xfb   : > { %1535 = vmatpush3.bf16.msra.mxu0 %v1721_v8 }
  0xfc   : > { %1536 = vmatprep.subr.bf16.mxu0 %v1722_v9  ;;  %1559 = vmatpush3.bf16.msra.mxu1 %v1737_v25 }
  0xfd   : > { %1560 = vmatprep.subr.bf16.mxu1 %v1912_v15 }
  0xff   : > { %1537 = vmatpush3.bf16.msra.mxu0 %v1722_v9 }
 0x100   : > { %1538 = vmatprep.subr.bf16.mxu0 %v1723_v10  ;;  %1561 = vmatpush3.bf16.msra.mxu1 %v1739_v27 }
 0x101   : > { %1562 = vmatprep.subr.bf16.mxu1 %v1912_v15 }
 0x103   : > { %1539 = vmatpush3.bf16.msra.mxu0 %v1723_v10 }
 0x104   : > { %1540 = vmatprep.subr.bf16.mxu0 %v1724_v11  ;;  %1563 = vmatpush3.bf16.msra.mxu1 %v1741_v29 }
 0x105   : > { %1564 = vmatprep.subr.bf16.mxu1 %v1912_v15 }
 0x107   : > { %1541 = vmatpush3.bf16.msra.mxu0 %v1724_v11 }
 0x108   : > { %1542 = vmatprep.subr.bf16.mxu0 %v1725_v12  ;;  %1565 = vmatpush3.bf16.msra.mxu1 %v1743_v30 }
 0x109   : > { %1590 = vmatprep.subr.bf16.mxu1 %v1912_v15 }
 0x10b   : > { %1543 = vmatpush3.bf16.msra.mxu0 %v1725_v12 }
 0x10c   : > { %1544 = vmatprep.subr.bf16.mxu0 %v1726_v13 }
 0x10f   : > { %1545 = vmatpush3.bf16.msra.mxu0 %v1726_v13 }
 0x110   : > { %1570 = vmatprep.subr.bf16.mxu0 %v1912_v15 }
 0x112   : > { %1547 = vmatmul.mubr.bf16.vlgmr.msra.gmra.mrb[4].mxu0 %v651_v3 }
 0x113   : > { %1571 = vmatpush3.bf16.msra.mxu0 %v1727_v14  ;;  %1586 = vmatprep.mubr.msk.bf16.mxu0 %vm1913_vm2, %v1912_v15 }
 0x114   : > { %1572 = vmatprep.subr.bf16.mxu0 %v1912_v15 }
 0x117   : > { %1573 = vmatpush3.bf16.msra.mxu0 %v1728_v16 }
 0x118   : > { %1574 = vmatprep.subr.bf16.mxu0 %v1912_v15 }
 0x11b   : > { %1575 = vmatpush3.bf16.msra.mxu0 %v1730_v18 }
 0x11c   : > { %1576 = vmatprep.subr.bf16.mxu0 %v1912_v15 }
 0x11f   : > { %1577 = vmatpush3.bf16.msra.mxu0 %v1732_v20 }
 0x120   : > { %1578 = vmatprep.subr.bf16.mxu0 %v1912_v15 }
 0x123   : > { %1579 = vmatpush3.bf16.msra.mxu0 %v1734_v22 }
 0x124   : > { %1580 = vmatprep.subr.bf16.mxu0 %v1912_v15 }
 0x127   : > { %1581 = vmatpush3.bf16.msra.mxu0 %v1736_v24 }
 0x128   : > { %1582 = vmatprep.subr.bf16.mxu0 %v1912_v15 }
 0x12b   : > { %1583 = vmatpush3.bf16.msra.mxu0 %v1738_v26 }
 0x12c   : > { %1584 = vmatprep.subr.bf16.mxu0 %v1912_v15 }
 0x12f   : > { %1585 = vmatpush3.bf16.msra.mxu0 %v1740_v28 }
 0x1be   : > { %v1528_v31 = vpop.f32.mrb[0].mxu1 }
 0x1bf   : > { %v615_v32 = vpop.f32.mrb[1].mxu1 }
 0x1c0   : > { %v1529_v33 = vpop.f32.mrb[2].mxu1 }
 0x1c1   : > { %v618_v34 = vpop.f32.mrb[3].mxu1 }
 0x1c5   : > { %v1508_v35 = vpop.f32.mrb[0].mxu0 }
 0x1c6   : > { %v624_v36 = vadd.f32 %v1528_v31, %v1508_v35  ;;  %v514_v37 = vpop.f32.mrb[1].mxu0 }
 0x1c7   : > { %v616_v38 = vadd.f32 %v615_v32, %v514_v37  ;;  %v1509_v39 = vpop.f32.mrb[2].mxu0  ;;  %v1746_v37 = vld [vmem:[#allocation7 + $0x80] sm:$0xff]  }
 0x1c8   : > { %v517_v40 = vpop.f32.mrb[3].mxu0  ;;  %v1747_v39 = vld [vmem:[#allocation7 + $0x88] sm:$0xff]  }
 0x1c9   : > { %v619_v41 = vadd.f32 %v618_v34, %v517_v40  ;;  %v1748_v40 = vld [vmem:[#allocation7 + $0x90] sm:$0xff]  }
 0x1e5   : > { %v1548_v42 = vpop.f32.mrb[4].mxu0 }
 0x1e6   : > { %v753_v44 = vadd.f32 %v1548_v42, %v624_v36  ;;  %v737_v45 = vpop.f32.mrb[5].mxu0  ;;  %v1750_v42 = vld [vmem:[#allocation7 + $0xa0] sm:$0xff]  }
 0x1e7   : > { %v751_v46 = vadd.f32 %v737_v45, %v616_v38  ;;  %v1549_v47 = vpop.f32.mrb[6].mxu0  ;;  %v1752_v45 = vld [vmem:[#allocation7 + $0xb0] sm:$0xff]  }
 0x1e8   : > { %v763_v48 = vadd.f32 %v1383_v43, %v753_v44  ;;  %v740_v49 = vpop.f32.mrb[7].mxu0  ;;  %v1753_v47 = vld [vmem:[#allocation7 + $0xb8] sm:$0xff]  }
 0x1e9   : > { %v761_v50 = vadd.f32 %v1383_v43, %v751_v46  ;;  %v752_v51 = vadd.f32 %v740_v49, %v619_v41  ;;  %v1749_v41 = vld [vmem:[#allocation7 + $0x98] sm:$0xff]  }
 0x1ea   : > { %v766_v52 = vmul.f32 %v763_v48, %v763_v48 }
 0x1eb   : > { %v764_v53 = vmul.f32 %v761_v50, %v761_v50  ;;  %v762_v54 = vadd.f32 %v1383_v43, %v752_v51  ;;  %v1751_v43 = vld [vmem:[#allocation7 + $0xa8] sm:$0xff]  }
 0x1ec   : > { %v769_v55 = vmul.f32 %v766_v52, %v763_v48 }
 0x1ed   : > { %v767_v56 = vmul.f32 %v764_v53, %v761_v50  ;;  %v765_v57 = vmul.f32 %v762_v54, %v762_v54 }
 0x1ee   : > { %v772_v58 = vmul.f32 0.044715, %v769_v55 }
 0x1ef   : > { %v770_v59 = vmul.f32 0.044715, %v767_v56  ;;  %v768_v60 = vmul.f32 %v765_v57, %v762_v54 }
 0x1f0   : > { %v775_v61 = vadd.f32 %v772_v58, %v763_v48 }
 0x1f1   : > { %v773_v62 = vadd.f32 %v770_v59, %v761_v50  ;;  %v771_v63 = vmul.f32 0.044715, %v768_v60 }
 0x1f2   : > { %v778_v0 = vmul.f32 0.7978846, %v775_v61  ;;  %v1418_v61 = vld [vmem:[%s2208_s5] ss:$0 sm:$0xff] }
 0x1f3   : > { %v774_v1 = vadd.f32 %v771_v63, %v762_v54  ;;  %v776_v2 = vmul.f32 0.7978846, %v773_v62 }
 0x1f4   : > { %1755 = vtanh.f32 %v778_v0 }
 0x1f5   : > { %v777_v3 = vmul.f32 0.7978846, %v774_v1  ;;  %1757 = vtanh.f32 %v776_v2 }
 0x1f7   : > { %1759 = vtanh.f32 %v777_v3 }
 0x1fe   : > { %v1756_v4 = vpop.eup %1755 }
 0x1ff   : > { %v1758_v5 = vpop.eup %1757  ;;  %v784_v6 = vadd.f32 1.0, %v1756_v4  ;;  %v1199_v4 = vpop.permute.xlu0 %1198 }
 0x200   : > { %v782_v8 = vadd.f32 1.0, %v1758_v5 }
 0x201   : > { %v1760_v9 = vpop.eup %1759  ;;  %v787_v10 = vmul.f32 0.5, %v784_v6 }
 0x202   : > { %v783_v11 = vadd.f32 1.0, %v1760_v9  ;;  %v785_v12 = vmul.f32 0.5, %v782_v8 }
 0x203   : > { %v790_v13 = vmul.f32 %v787_v10, %v763_v48 }
 0x204   : > { %v786_v14 = vmul.f32 0.5, %v783_v11  ;;  %v788_v17 = vmul.f32 %v785_v12, %v761_v50 }
 0x205   : > { %v799_v16 = vpack.c.bf16 %v790_v13, %v790_v13 }
 0x206   : > { %v789_v18 = vmul.f32 %v786_v14, %v762_v54 }
 0x207   : > { %v811_v20 = vmul.bf16 %v808_v19, %v799_v16 }
 0x208   : > { %v798_v21 = vpack.c.bf16 %v789_v18, %v788_v17 }
 0x209   : > { %v1389_v22 = vcombine.low %v811_v20, %v811_v20 }
 0x20a   : > { %v810_v23 = vmul.bf16 %v803_v7, %v798_v21  ;;  %v1204_v7 = vpop.permute.xlu1 %1203 }
 0x20b   : > { %825 = vst [vmem:[#allocation3 + $0x8] sm:$0x1] %v1389_v22 }
 0x20c   : > { %v1387_v24 = vcombine.low %v810_v23, %v810_v23  ;;  %v1388_v25 = vcombine.high %v810_v23, %v810_v23 }
 0x20e   : > { %823 = vst [vmem:[#allocation3] sm:$0xf] %v1387_v24  ;;  %824 = vst [vmem:[#allocation3 + $0x4] sm:$0xf] %v1388_v25 }
 0x212   : > { %v1745_v26 = vld [vmem:[#allocation3 + $0x8] ss:$0 sps:$4 sm:$0x11]  }
 0x213   : > { %v879_v32 = vshll.u32 %v1745_v26, 16  ;;  %v1089_v49 = vrot.slane %v1745_v26, 1 }
 0x215   : > { %v1742_v27 = vld [vmem:[#allocation3] sm:$0xff]   ;;  %v881_v36 = vrot.slane %v879_v32, 1 }
 0x216   : > { %v844_v28 = vld [vmem:[#allocation3] sm:$0xf]  ;;  %v845_v29 = vld [vmem:[#allocation3 + $0x4] sm:$0xf]  ;;  %1587 = vmatmul.mubr.bf16.vlgmr.msra.gmra.mrb[8].mxu0 %v1742_v27 }
 0x217   : > { %v1390_v30 = vcombine.low %v844_v28, %v845_v29  ;;  %v1068_v44 = vld [vmem:[#allocation3] sm:$0xe] }
 0x218   : > { %v1409_v46 = vcombine.low %v1068_v44, %v845_v29 }
 0x219   : > { %v874_v31 = vshll.u32 %v1390_v30, 16  ;;  %v872_v33 = vshrl.u32 %v1390_v30, 16 }
 0x21a   : > { %v1088_v48 = vrot.slane %v1409_v46, 1 }
 0x21b   : > { %v876_v34 = vrot.slane %v874_v31, 1 }
 0x21c   : > { %v1090_v50 = vsel %vm649_vm1, %v1088_v48, %v1089_v49 }
 0x21d   : > { %v877_v35 = vor.u32 %v876_v34, %v872_v33 }
 0x21f   : > { %v882_v38 = vsel %vm414_vm0, %v877_v35, %v881_v36 }
 0x220   : > { %1567 = vmatmul.mubr.bf16.vlgmr.msra.gmra.mrb[4].mxu1 %v882_v38 }
 0x221   : > { %1591 = vmatpush3.bf16.msra.mxu1 %v1746_v37  ;;  %1606 = vmatprep.mubr.msk.bf16.mxu1 %vm1913_vm2, %v1912_v15 }
 0x222   : > { %1592 = vmatprep.subr.bf16.mxu1 %v1912_v15 }
 0x225   : > { %1593 = vmatpush3.bf16.msra.mxu1 %v1747_v39 }
 0x226   : > { %1594 = vmatprep.subr.bf16.mxu1 %v1912_v15 }
 0x229   : > { %1595 = vmatpush3.bf16.msra.mxu1 %v1748_v40 }
 0x22a   : > { %1596 = vmatprep.subr.bf16.mxu1 %v1912_v15 }
 0x22d   : > { %1597 = vmatpush3.bf16.msra.mxu1 %v1749_v41 }
 0x22e   : > { %1598 = vmatprep.subr.bf16.mxu1 %v1912_v15 }
 0x231   : > { %1599 = vmatpush3.bf16.msra.mxu1 %v1750_v42 }
 0x232   : > { %1600 = vmatprep.subr.bf16.mxu1 %v1912_v15 }
 0x235   : > { %1601 = vmatpush3.bf16.msra.mxu1 %v1751_v43 }
 0x236   : > { %1602 = vmatprep.subr.bf16.mxu1 %v1912_v15 }
 0x239   : > { %1603 = vmatpush3.bf16.msra.mxu1 %v1752_v45 }
 0x23a   : > { %1604 = vmatprep.subr.bf16.mxu1 %v1912_v15 }
 0x23d   : > { %1605 = vmatpush3.bf16.msra.mxu1 %v1753_v47 }
 0x240   : > { %1607 = vmatmul.mubr.bf16.vlgmr.msra.gmra.mrb[8].mxu1 %v1090_v50 }
 0x2e9   : > { %v1061_v51 = vpop.f32.mrb[8].mxu0 }
 0x2ea   : > { %v1588_v52 = vpop.f32.mrb[9].mxu0 }
 0x2eb   : > { %v1064_v53 = vpop.f32.mrb[10].mxu0 }
 0x2ec   : > { %v1589_v54 = vpop.f32.mrb[11].mxu0 }
 0x2f3   : > { %v966_v55 = vpop.f32.mrb[4].mxu1 }
 0x2f4   : > { %v1062_v56 = vadd.f32 %v1061_v51, %v966_v55  ;;  %v1568_v57 = vpop.f32.mrb[5].mxu1 }
 0x2f5   : > { %v969_v58 = vpop.f32.mrb[6].mxu1 }
 0x2f6   : > { %v1065_v59 = vadd.f32 %v1064_v53, %v969_v58  ;;  %v1569_v60 = vpop.f32.mrb[7].mxu1 }
 0x313   : > { %v1174_v15 = vpop.f32.mrb[8].mxu1 }
 0x314   : > { %v1181_v62 = vadd.f32 %v1174_v15, %v1062_v56  ;;  %v1608_v63 = vpop.f32.mrb[9].mxu1 }
 0x315   : > { %v1177_v0 = vpop.f32.mrb[10].mxu1 }
 0x316   : > { %v1190_v1 = vadd.f32 %v1418_v61, %v1181_v62  ;;  %v1182_v2 = vadd.f32 %v1177_v0, %v1065_v59  ;;  %v1609_v3 = vpop.f32.mrb[11].mxu1 }
 0x318   : > { %v1206_v5 = vmul.f32 %v1199_v4, %v1190_v1  ;;  %v1191_v6 = vadd.f32 %v1418_v61, %v1182_v2 }
 0x31a   : > { %1208 = vst [vmem:[%s303_s29] sm:$0xff] %v1206_v5  ;;  %v1207_v8 = vmul.f32 %v1204_v7, %v1191_v6 }
 0x31c   : > { %1209 = vst [vmem:[%s303_s29 + $0x8] sm:$0xff] %v1207_v8 }
 0x31d   : > { %1830 = shalt.err (!%p1827_p6)
}
 0x31e   : > { %s1831_s28 = scalar_lea.hbm %s2155_s18, 256  ;;  %s1835_s13 = scalar_lea.hbm %s2209_s6, 512 }
 0x31f   : > { %p1832_p7 = scmp.ne.s32.totalorder %s2155_s18, %s1831_s28  ;;  %p1836_p0 = scmp.lt.u32.totalorder %s2155_s18, %s2209_s6 }
 0x320   : > { %p1837_p4 = scmp.lt.u32.totalorder %s1835_s13, %s1831_s28  ;;  %p1839_p13 = scmp.lt.u32.totalorder %s1831_s28, %s2155_s18 }
 0x321   : > { %p1833_p9 = pnand %p1832_p7, %p2225_p8 }
 0x322   : > { %p1838_p1 = por %p1837_p4, %p1836_p0 }
 0x323   : > { %p1834_p12 = pneg %p1833_p9 }
 0x324   : > { %p1840_p10 = por %p1839_p13, %p1838_p1 }
 0x326   : > { %p1841_p11 = pnand %p1840_p10, %p1834_p12 }
 0x328   : > { %1844 = shalt.err (!%p1841_p11)
}
 0x329   : > { %s1915_s29 = smov 128   ;;  %s1916_s15 = smov 8  }
 0x32a   : > { %1620 = dma.vmem_to_hbm [thread:$0]  (%p2225_p8), %s2150_s11, 256, %s2155_s18, %s2157_s12, %s1915_s29, %s1915_s29, %s1916_s15  }
 0x32b PF: > { %p1637_p2 = scmp.ge.s32.totalorder %s1903_s26, 2  ;;  %s1241_s17 = sand.u32 1, %s1883_s21  }
 0x32c   : > { %p2226_p3 = scmp.ne.s32.totalorder %s2219_s9, 0  ;;  %s1242_s16 = scalar_lea.sflag [#allocation6], %s1241_s17 }
 0x32e   : > { %p1630_p5 = pnand %p1637_p2, %p2226_p3 }
 0x330   : > { %1878 = dma.done.wait (!%p1630_p5), %s1242_s16, 256  }
 0x331   : > { %1880 = vsyncadd (!%p1630_p5), %s1242_s16, 4294967040  ;;  %s21_s26 = sadd.s32 1, %s1903_s26   ;;  %s2227_s24 = sld [smem:[#allocation13_spill]] }
 0x332   : > { %p18_p6 = scmp.ge.s32.totalorder %s21_s26, 4   ;;  %s2228_s25 = sld [smem:[#allocation14_spill]] }
 0x333   : > { %s2229_s21 = smov %s1887_s22  ;;  %s2230_s22 = smov %s1891_s23 }
 0x334   : > { %s2231_s23 = smov %s2005_s10  ;;  %20 = sbr.rel (!%p18_p6) target bundleno = 6 (0x6), region = 95 }
 0x33b   :  { %1247 = vsyncpa [#allocation5], 1 }
 0x33c   :  { %1249 = vsyncpa [#allocation5 + $0x1], 1 }
 0x33d   :  { %1250 = vsyncpa [#allocation8], 1 }
 0x33e   :  { %1251 = vsyncpa [#allocation6], 1 }
 0x33f   :  { %1253 = vsyncpa [#allocation6 + $0x1], 1 }

</bundles_post_ra>
